<compile_context>
chip_gen: v6e
topology: v6e:2x2x1
jax: 0.10.0
libtpu: 0.0.40
codegen_flags: <defaults>
</compile_context>

<pallas_src>
import jax
import jax.numpy as jnp
from jax.experimental import pallas as pl
from jax.experimental.pallas import tpu as pltpu


# --------------------------------------------------------------------------- #
# Shared in-kernel helpers (packed [rows, W/2, 2C] layout:
#   lane j of pair wp holds pixel (2*wp + j // C), channel (j % C))
# --------------------------------------------------------------------------- #
def _lane_pair_swap(v):
    """Swap the two packed pixels of every lane pair (lane roll by half width)."""
    r, wp, c2 = v.shape
    cc = c2 // 2
    if wp % 8 == 0:
        # Sublane-aligned merge -> free reshape -> one XLU lane roll on a 2-D tile.
        return pltpu.roll(v.reshape(r * wp, c2), shift=cc, axis=1).reshape(r, wp, c2)
    # General-Wp fallback (no relayout assumptions): two lane slices + concat.
    return jnp.concatenate([v[..., cc:], v[..., :cc]], axis=-1)


def _w_shifts(v):
    """(v at w-1, v at w+1) along the *unpacked* W axis, zero past the W edges."""
    r, wp, c2 = v.shape
    cc = c2 // 2
    swap = _lane_pair_swap(v)
    z = jnp.zeros((r, 1, c2), v.dtype)
    nxt = jnp.concatenate([swap[:, 1:, :], z], axis=1)    # neighbour pair wp+1
    prv = jnp.concatenate([z, swap[:, :-1, :]], axis=1)   # neighbour pair wp-1
    # TODO(synk): replace the two zero-block concats with a sublane roll + edge
    # mask once the sublane roll direction is pinned down (few-% VALU win).
    is_left = jax.lax.broadcasted_iota(jnp.int32, (wp, c2), 1) < cc
    v_m1 = jnp.where(is_left, prv, swap)                  # pixel w-1
    v_p1 = jnp.where(is_left, swap, nxt)                  # pixel w+1
    return v_m1, v_p1


def _dwconv3x3(v_ext, w9, rows):
    """Depthwise 3x3 conv.  v_ext has rows+2 rows (1-row halo each side),
    w9 is [9, 2C] with k = dy*3 + dx.  Returns [rows, Wp, 2C]."""
    vm1, vp1 = _w_shifts(v_ext)
    taps = (vm1, v_ext, vp1)                              # dx = -1, 0, +1
    acc = None
    for dy in range(3):
        for dx in range(3):
            term = taps[dx][dy:dy + rows] * w9[dy * 3 + dx]
            acc = term if acc is None else acc + term     # first-tap init
    return acc


def _finalize(pj, x_tile, pw_bd, sc_bd, bias):
    """proj pointwise (BN folded) + shortcut ConvBN as two accumulated MXU dots
    (no [M, 4C] concatenated operand), bias add, ReLU6."""
    th, wp, c2 = pj.shape
    m = th * wp
    out = (jnp.dot(pj.reshape(m, c2), pw_bd, preferred_element_type=jnp.float32)
           + jnp.dot(x_tile.reshape(m, c2), sc_bd, preferred_element_type=jnp.float32)
           + bias)
    return jnp.clip(out, 0.0, 6.0).reshape(th, wp, c2)


# --------------------------------------------------------------------------- #
# Kernels
# --------------------------------------------------------------------------- #
def _frh_whole_kernel(x_ref, paw_ref, pab_ref, pjw_ref, caw1_ref, caw2_ref,
                      pww_ref, scw_ref, bias_ref, o_ref):
    """Small-image fast path: grid=(B,), whole image resident, SE gate in-kernel."""
    x = x_ref[0]                                          # [H, Wp, 2C]
    h, wp, c2 = x.shape

    # ca gate: global average pool -> 1x1 -> ReLU6 -> 1x1 -> sigmoid, in VMEM.
    pooled = jnp.mean(jnp.mean(x, axis=0), axis=0, keepdims=True)          # [1, 2C]
    h1 = jnp.clip(jnp.dot(pooled, caw1_ref[...],
                          preferred_element_type=jnp.float32), 0.0, 6.0)
    gate = jax.nn.sigmoid(jnp.dot(h1, caw2_ref[...],
                                  preferred_element_type=jnp.float32))     # [1, 2C]

    zrow = jnp.zeros((1, wp, c2), x.dtype)
    x_ext = jnp.concatenate([zrow, x, zrow], axis=0)                       # [H+2, Wp, 2C]
    pa = _dwconv3x3(x_ext, paw_ref[...], h) + pab_ref[...]
    y = x * (jax.nn.sigmoid(pa) + gate)                   # fused pa + ca gates
    y_ext = jnp.concatenate([zrow, y, zrow], axis=0)      # y is 0 outside the image
    pj = _dwconv3x3(y_ext, pjw_ref[...], h)               # proj depthwise (BN folded below)
    o_ref[0] = _finalize(pj, x, pww_ref[...], scw_ref[...], bias_ref[...])


def _frh_tiled_kernel(x_hbm, gate_ref, paw_ref, pab_ref, pjw_ref,
                      pww_ref, scw_ref, bias_ref, o_ref, xbuf, sem):
    """H-tiled path: halo rows come from a manual DMA window into the single
    zero-padded HBM image (no halo side-array, no in-kernel x_ext concat)."""
    b = pl.program_id(0)
    t = pl.program_id(1)
    th = o_ref.shape[1]

    # [TH+4, Wp, 2C] window of the (H+4)-row padded image starting at row t*TH.
    cp = pltpu.make_async_copy(x_hbm.at[b, pl.ds(t * th, th + 4)], xbuf, sem)
    cp.start()
    cp.wait()
    x_ext = xbuf[...]                                     # [TH+4, Wp, 2C]

    pa = _dwconv3x3(x_ext, paw_ref[...], th + 2) + pab_ref[...]
    x_mid = x_ext[1:th + 3]                               # tile rows + 1-row border
    y = x_mid * (jax.nn.sigmoid(pa) + gate_ref[0])        # fused pa + ca gates
    pj = _dwconv3x3(y, pjw_ref[...], th)                  # [TH, Wp, 2C]
    o_ref[0] = _finalize(pj, x_ext[2:th + 2], pww_ref[...], scw_ref[...], bias_ref[...])


# --------------------------------------------------------------------------- #
# Wrapper
# --------------------------------------------------------------------------- #
_VMEM_LIMIT = 48 * 1024 * 1024                 # leaves headroom inside v7x's 64 MiB


def _block_diag2(w):
    z = jnp.zeros_like(w)
    return jnp.concatenate(
        [jnp.concatenate([w, z], axis=1), jnp.concatenate([z, w], axis=1)], axis=0)


def _ca_gate(x_nhwc, params):
    # Squeeze/excite gate (XLA pre-pass; used only by the tiled path).
    hp = jax.lax.Precision.HIGHEST
    pooled = jnp.mean(x_nhwc, axis=(1, 2))                               # [B, C]
    h1 = jnp.clip(jnp.dot(pooled, params["ca_w1"], precision=hp), 0.0, 6.0)
    return jax.nn.sigmoid(jnp.dot(h1, params["ca_w2"], precision=hp))    # [B, C]


def _pick_tile_h(H, row_bytes, budget_bytes, overhead=12):
    """Largest divisor of H whose ~overhead x tile footprint fits the VMEM budget
    (budget sized for v7x's 64 MiB VMEM; v5e/v6e simply get extra headroom)."""
    cap = max(1, budget_bytes // (overhead * row_bytes))
    best = 1
    for th in range(1, H + 1):
        if th <= cap and H % th == 0:
            best = th
    return best
    # TODO(synk): support remainder H tiles (non-divisor TH) via a ragged last tile.


def _prep_packed_params(params, C):
    t2 = lambda a: jnp.tile(a, (1, 2))
    pa_w2, pa_b2 = t2(params["pa_w"]), t2(params["pa_b"])
    pj_w2 = t2(params["pj_w"])
    # Fold proj BN and shortcut BN into the matmul weights/bias:
    #   pointwise(BN(dw(y))) = dw(y) @ (diag(pj_s) @ pw_w) + pj_b @ pw_w
    #   shortcut(x)          = x @ (sc_w * sc_s) + sc_b
    pw_bd = _block_diag2(params["pj_s"][0][:, None] * params["pw_w"])   # [2C, 2C]
    sc_bd = _block_diag2(params["sc_w"] * params["sc_s"])               # [2C, 2C]
    bias2 = t2(params["pj_b"] @ params["pw_w"] + params["sc_b"])        # [1, 2C]
    return pa_w2, pa_b2, pj_w2, pw_bd, sc_bd, bias2


def _prep_ca_params(params, C):
    # Packed-layout ca weights for the in-kernel gate; bottleneck dim is padded
    # to a lane-friendly 128 with zeros (exact: ReLU6(0)=0 contributes nothing).
    ca_w1, ca_w2 = params["ca_w1"], params["ca_w2"]
    cr = ca_w1.shape[1]
    crp = max(128, ((cr + 127) // 128) * 128)
    caw1_2 = jnp.zeros((2 * C, crp), jnp.float32).at[:, :cr].set(
        0.5 * jnp.concatenate([ca_w1, ca_w1], axis=0))
    caw2_2 = jnp.zeros((crp, 2 * C), jnp.float32).at[:cr, :].set(
        jnp.concatenate([ca_w2, ca_w2], axis=1))
    return caw1_2, caw2_2


def feature_refinement_head_nhwc(x, params, *, max_whole_image_bytes=2 << 20,
                                 tile_budget_bytes=24 << 20, tile_h=None):
    """x: [B, H, W, C] float32 (NHWC).  Returns [B, H, W, C] float32."""
    B, H, W, C = x.shape
    assert W % 2 == 0, "even width required for the lane-packed layout"
    # TODO(synk): add an unpacked (C-lane) fallback path for odd widths.
    x = x.astype(jnp.float32)
    wp, c2 = W // 2, 2 * C
    xp = x.reshape(B, H, wp, c2)               # lane-dense packing (free reshape)

    pa_w2, pa_b2, pj_w2, pw_bd, sc_bd, bias2 = _prep_packed_params(params, C)

    img_bytes = H * wp * c2 * 4
    if tile_h is None and img_bytes <= max_whole_image_bytes:
        # ---- small-image fast path: one grid step per batch, gate in-kernel,
        # ---- no pad / halo / gate XLA pre-passes, no HBM round trips.
        caw1_2, caw2_2 = _prep_ca_params(params, C)

        def const(a):
            return pl.BlockSpec(a.shape, lambda b: (0,) * a.ndim)

        out = pl.pallas_call(
            _frh_whole_kernel,
            out_shape=jax.ShapeDtypeStruct((B, H, wp, c2), jnp.float32),
            grid_spec=pltpu.PrefetchScalarGridSpec(
                num_scalar_prefetch=0,
                grid=(B,),
                in_specs=[
                    pl.BlockSpec((1, H, wp, c2), lambda b: (b, 0, 0, 0)),
                    const(pa_w2), const(pa_b2), const(pj_w2),
                    const(caw1_2), const(caw2_2),
                    const(pw_bd), const(sc_bd), const(bias2),
                ],
                out_specs=pl.BlockSpec((1, H, wp, c2), lambda b: (b, 0, 0, 0)),
            ),
            compiler_params=pltpu.CompilerParams(
                dimension_semantics=("parallel",),
                vmem_limit_bytes=_VMEM_LIMIT),
        )(xp, pa_w2, pa_b2, pj_w2, caw1_2, caw2_2, pw_bd, sc_bd, bias2)
        return out.reshape(B, H, W, C)

    # ---- H-tiled path (large images): manual halo DMA from one zero-padded copy.
    th = tile_h if tile_h is not None else _pick_tile_h(H, wp * c2 * 4, tile_budget_bytes)
    assert H % th == 0, f"tile_h={th} must divide H={H}"
    nt = H // th
    # The SE gate is a cross-tile global reduction -> tiny XLA pre-pass per batch.
    gate = jnp.tile(_ca_gate(x, params), (1, 2)).reshape(B, 1, c2)
    xpad = jnp.pad(xp, ((0, 0), (2, 2), (0, 0), (0, 0)))   # single padded HBM copy

    def const2(a):
        return pl.BlockSpec(a.shape, lambda b, t: (0,) * a.ndim)

    out = pl.pallas_call(
        _frh_tiled_kernel,
        out_shape=jax.ShapeDtypeStruct((B, H, wp, c2), jnp.float32),
        grid_spec=pltpu.PrefetchScalarGridSpec(
            num_scalar_prefetch=0,
            grid=(B, nt),
            in_specs=[
                pl.BlockSpec(memory_space=pl.ANY),                     # padded x (HBM)
                pl.BlockSpec((1, 1, c2), lambda b, t: (b, 0, 0)),      # ca gate
                const2(pa_w2), const2(pa_b2), const2(pj_w2),
                const2(pw_bd), const2(sc_bd), const2(bias2),
            ],
            out_specs=pl.BlockSpec((1, th, wp, c2), lambda b, t: (b, t, 0, 0)),
            scratch_shapes=[pltpu.VMEM((th + 4, wp, c2), jnp.float32),
                            pltpu.SemaphoreType.DMA(())],
        ),
        compiler_params=pltpu.CompilerParams(
            dimension_semantics=("parallel", "parallel"),
            vmem_limit_bytes=_VMEM_LIMIT),
    )(xpad, gate, pa_w2, pa_b2, pj_w2, pw_bd, sc_bd, bias2)
    return out.reshape(B, H, W, C)


@jax.jit
def feature_refinement_head(x_nchw, params):
    """NCHW compatibility wrapper (matches the PyTorch module's layout)."""
    x = jnp.transpose(x_nchw, (0, 2, 3, 1))
    return jnp.transpose(feature_refinement_head_nhwc(x, params), (0, 3, 1, 2))


# --------------------------------------------------------------------------- #
# Parameters (synthetic, shapes follow the PyTorch module) + pure-JAX reference
# --------------------------------------------------------------------------- #
def _fold_bn(gamma, beta, mean, var, eps=1e-5):
    scale = gamma / jnp.sqrt(var + eps)
    bias = beta - mean * scale
    return scale[None, :], bias[None, :]          # [1, C]


def make_params(key, C):
    ks = jax.random.split(key, 16)
    Cr = max(1, C // 16)
    u = lambda k, shape, s=0.2: jax.random.uniform(k, shape, jnp.float32, -s, s)

    pa_w = u(ks[0], (9, C))                       # depthwise 3x3, k = dy*3 + dx
    pa_b = u(ks[1], (1, C))
    ca_w1 = u(ks[2], (C, Cr), 0.5)                # [in, out]
    ca_w2 = u(ks[3], (Cr, C), 0.5)
    sc_w = u(ks[4], (C, C))                       # 1x1 conv [in, out]
    sc_s, sc_b = _fold_bn(
        gamma=1.0 + u(ks[5], (C,), 0.1),
        beta=u(ks[6], (C,), 0.1),
        mean=u(ks[7], (C,), 0.1),
        var=1.0 + jax.random.uniform(ks[8], (C,), jnp.float32, 0.0, 0.5))
    pj_w = u(ks[9], (9, C))
    pj_s, pj_b = _fold_bn(
        gamma=1.0 + u(ks[10], (C,), 0.1),
        beta=u(ks[11], (C,), 0.1),
        mean=u(ks[12], (C,), 0.1),
        var=1.0 + jax.random.uniform(ks[13], (C,), jnp.float32, 0.0, 0.5))
    pw_w = u(ks[14], (C, C))

    return dict(pa_w=pa_w, pa_b=pa_b, ca_w1=ca_w1, ca_w2=ca_w2,
                sc_w=sc_w, sc_s=sc_s, sc_b=sc_b,
                pj_w=pj_w, pj_s=pj_s, pj_b=pj_b, pw_w=pw_w)


def _reference_nhwc(x, p):
    """Straightforward NHWC reference of the module's forward pass."""
    B, H, W, C = x.shape
    hp = jax.lax.Precision.HIGHEST

    def dw9(v, w):
        vpad = jnp.pad(v, ((0, 0), (1, 1), (1, 1), (0, 0)))
        acc = jnp.zeros_like(v)
        for k in range(9):
            dy, dx = k // 3, k % 3
            acc = acc + vpad[:, dy:dy + H, dx:dx + W, :] * w[k]
        return acc

    sc = jnp.einsum("bhwc,cd->bhwd", x, p["sc_w"], precision=hp) * p["sc_s"][0] + p["sc_b"][0]
    pa = jax.nn.sigmoid(dw9(x, p["pa_w"]) + p["pa_b"][0]) * x
    gate = _ca_gate(x, p)
    y = pa + x * gate[:, None, None, :]
    pj = dw9(y, p["pj_w"]) * p["pj_s"][0] + p["pj_b"][0]
    out = jnp.einsum("bhwc,cd->bhwd", pj, p["pw_w"], precision=hp) + sc
    return jnp.clip(out, 0.0, 6.0)


# --------------------------------------------------------------------------- #
if __name__ == "__main__":
    key = jax.random.PRNGKey(0)
    kx, kp, kx2 = jax.random.split(key, 3)

    # ---- main test: module-default channels, small image -> whole-image path.
    B, C, H, W = 2, 64, 16, 16                    # decode_channels = 64 (module default)
    x = jax.random.normal(kx, (B, C, H, W), jnp.float32)
    params = make_params(kp, C)

    out = jax.block_until_ready(feature_refinement_head(x, params))
    assert out.shape == (B, C, H, W)
    assert bool(jnp.all(jnp.isfinite(out)))
    ref = jnp.transpose(_reference_nhwc(jnp.transpose(x, (0, 2, 3, 1)), params), (0, 3, 1, 2))
    err = float(jnp.max(jnp.abs(out - ref)))
    assert err < 2e-2, f"whole-image path mismatch vs reference: max abs err = {err}"

    # ---- second test: force the H-tiled manual-halo-DMA path (multiple tiles).
    B2, H2, W2 = 1, 64, 32
    x2 = jax.random.normal(kx2, (B2, H2, W2, C), jnp.float32)
    out2 = jax.block_until_ready(
        feature_refinement_head_nhwc(x2, params, tile_h=16))
    assert out2.shape == (B2, H2, W2, C)
    ref2 = _reference_nhwc(x2, params)
    err2 = float(jnp.max(jnp.abs(out2 - ref2)))
    assert err2 < 2e-2, f"tiled path mismatch vs reference: max abs err = {err2}"

    print("KERNEL_OK")
</pallas_src>

<mosaic_0001>
module attributes {stable_mosaic.version = 11 : i64} {
  func.func @_frh_whole_kernel(%arg0: i32, %arg1: memref<1x16x8x128xf32, #tpu.memory_space<vmem>>, %arg2: memref<9x128xf32, #tpu.memory_space<vmem>>, %arg3: memref<1x128xf32, #tpu.memory_space<vmem>>, %arg4: memref<9x128xf32, #tpu.memory_space<vmem>>, %arg5: memref<128x128xf32, #tpu.memory_space<vmem>>, %arg6: memref<128x128xf32, #tpu.memory_space<vmem>>, %arg7: memref<128x128xf32, #tpu.memory_space<vmem>>, %arg8: memref<128x128xf32, #tpu.memory_space<vmem>>, %arg9: memref<1x128xf32, #tpu.memory_space<vmem>>, %arg10: memref<1x16x8x128xf32, #tpu.memory_space<vmem>>) attributes {dimension_semantics = [#tpu.dimension_semantics<parallel>], iteration_bounds = array<i64: 2>, scalar_prefetch = 0 : i64, scratch_operands = 0 : i64, tpu.core_type = #tpu.core_type<tc>, window_params = [{transform_indices = @transform_0, window_bounds = array<i64: 1, 16, 8, 128>}, {pipeline_mode = #tpu.pipeline_mode<synchronous>, transform_indices = @transform_1, window_bounds = array<i64: 9, 128>}, {pipeline_mode = #tpu.pipeline_mode<synchronous>, transform_indices = @transform_2, window_bounds = array<i64: 1, 128>}, {pipeline_mode = #tpu.pipeline_mode<synchronous>, transform_indices = @transform_3, window_bounds = array<i64: 9, 128>}, {pipeline_mode = #tpu.pipeline_mode<synchronous>, transform_indices = @transform_4, window_bounds = array<i64: 128, 128>}, {pipeline_mode = #tpu.pipeline_mode<synchronous>, transform_indices = @transform_5, window_bounds = array<i64: 128, 128>}, {pipeline_mode = #tpu.pipeline_mode<synchronous>, transform_indices = @transform_6, window_bounds = array<i64: 128, 128>}, {pipeline_mode = #tpu.pipeline_mode<synchronous>, transform_indices = @transform_7, window_bounds = array<i64: 128, 128>}, {pipeline_mode = #tpu.pipeline_mode<synchronous>, transform_indices = @transform_8, window_bounds = array<i64: 1, 128>}, {transform_indices = @transform_9, window_bounds = array<i64: 1, 16, 8, 128>}]} {
    %c0 = arith.constant 0 : index
    %c0_0 = arith.constant 0 : index
    %c0_1 = arith.constant 0 : index
    %c0_2 = arith.constant 0 : index
    %0 = vector.load %arg1[%c0, %c0_0, %c0_1, %c0_2] : memref<1x16x8x128xf32, #tpu.memory_space<vmem>>, vector<1x16x8x128xf32>
    %1 = vector.shape_cast %0 : vector<1x16x8x128xf32> to vector<16x8x128xf32>
    %cst = arith.constant dense<0.000000e+00> : vector<8x128xf32>
    %2 = vector.multi_reduction <add>, %1, %cst [0] : vector<16x8x128xf32> to vector<8x128xf32>
    %cst_3 = arith.constant 1.600000e+01 : f32
    %3 = vector.broadcast %cst_3 : f32 to vector<8x128xf32>
    %4 = arith.divf %2, %3 : vector<8x128xf32>
    %cst_4 = arith.constant dense<0.000000e+00> : vector<128xf32>
    %5 = vector.multi_reduction <add>, %4, %cst_4 [0] : vector<8x128xf32> to vector<128xf32>
    %6 = vector.shape_cast %5 : vector<128xf32> to vector<1x128xf32>
    %cst_5 = arith.constant 8.000000e+00 : f32
    %7 = vector.broadcast %cst_5 : f32 to vector<1x128xf32>
    %8 = arith.divf %6, %7 : vector<1x128xf32>
    %c0_6 = arith.constant 0 : index
    %c0_7 = arith.constant 0 : index
    %9 = vector.load %arg5[%c0_6, %c0_7] : memref<128x128xf32, #tpu.memory_space<vmem>>, vector<128x128xf32>
    %cst_8 = arith.constant dense<0.000000e+00> : vector<1x128xf32>
    %10 = tpu.matmul %8, %9, %cst_8 {dimension_numbers = #tpu.dot_dimension_numbers<[1], [0], [0], [1], [0, 0, 1, 1], [], []>} : vector<1x128xf32>, vector<128x128xf32>, vector<1x128xf32> -> vector<1x128xf32>
    %cst_9 = arith.constant 0.000000e+00 : f32
    %cst_10 = arith.constant 6.000000e+00 : f32
    %11 = vector.broadcast %cst_9 : f32 to vector<1x128xf32>
    %12 = arith.maximumf %11, %10 : vector<1x128xf32>
    %13 = vector.broadcast %cst_10 : f32 to vector<1x128xf32>
    %14 = arith.minimumf %13, %12 : vector<1x128xf32>
    %c0_11 = arith.constant 0 : index
    %c0_12 = arith.constant 0 : index
    %15 = vector.load %arg6[%c0_11, %c0_12] : memref<128x128xf32, #tpu.memory_space<vmem>>, vector<128x128xf32>
    %cst_13 = arith.constant dense<0.000000e+00> : vector<1x128xf32>
    %16 = tpu.matmul %14, %15, %cst_13 {dimension_numbers = #tpu.dot_dimension_numbers<[1], [0], [0], [1], [0, 0, 1, 1], [], []>} : vector<1x128xf32>, vector<128x128xf32>, vector<1x128xf32> -> vector<1x128xf32>
    %17 = arith.negf %16 : vector<1x128xf32>
    %18 = math.exp %17 : vector<1x128xf32>
    %cst_14 = arith.constant 1.000000e+00 : f32
    %19 = vector.broadcast %cst_14 : f32 to vector<1x128xf32>
    %20 = arith.addf %19, %18 : vector<1x128xf32>
    %21 = arith.divf %19, %20 : vector<1x128xf32>
    %cst_15 = arith.constant 0.000000e+00 : f32
    %22 = vector.broadcast %cst_15 : f32 to vector<1x8x128xf32>
    %23 = tpu.concatenate %22, %1, %22 in 0 : vector<1x8x128xf32>, vector<16x8x128xf32>, vector<1x8x128xf32> -> vector<18x8x128xf32>
    %c0_16 = arith.constant 0 : index
    %c0_17 = arith.constant 0 : index
    %24 = vector.load %arg2[%c0_16, %c0_17] : memref<9x128xf32, #tpu.memory_space<vmem>>, vector<9x128xf32>
    %25 = vector.shape_cast %23 : vector<18x8x128xf32> to vector<144x128xf32>
    %c64_i32 = arith.constant 64 : i32
    %26 = tpu.dynamic_rotate %25 by %c64_i32 dim 1 : vector<144x128xf32>, i32 -> vector<144x128xf32>
    %27 = vector.shape_cast %26 : vector<144x128xf32> to vector<18x8x128xf32>
    %cst_18 = arith.constant 0.000000e+00 : f32
    %28 = vector.broadcast %cst_18 : f32 to vector<18x1x128xf32>
    %29 = vector.extract_strided_slice %27 {offsets = [0, 1, 0], sizes = [18, 7, 128], strides = [1, 1, 1]} : vector<18x8x128xf32> to vector<18x7x128xf32>
    %30 = tpu.concatenate %29, %28 in 1 : vector<18x7x128xf32>, vector<18x1x128xf32> -> vector<18x8x128xf32>
    %31 = vector.extract_strided_slice %27 {offsets = [0, 0, 0], sizes = [18, 7, 128], strides = [1, 1, 1]} : vector<18x8x128xf32> to vector<18x7x128xf32>
    %32 = tpu.concatenate %28, %31 in 1 : vector<18x1x128xf32>, vector<18x7x128xf32> -> vector<18x8x128xf32>
    %33 = tpu.iota {dimensions = array<i32: 1>} : vector<8x128xi32>
    %c64_i32_19 = arith.constant 64 : i32
    %34 = vector.broadcast %c64_i32_19 : i32 to vector<8x128xi32>
    %35 = arith.cmpi slt, %33, %34 : vector<8x128xi32>
    %36 = vector.shape_cast %35 : vector<8x128xi1> to vector<1x8x128xi1>
    %37 = vector.broadcast %36 : vector<1x8x128xi1> to vector<18x8x128xi1>
    %38 = arith.select %37, %32, %27 : vector<18x8x128xi1>, vector<18x8x128xf32>
    %39 = vector.shape_cast %35 : vector<8x128xi1> to vector<1x8x128xi1>
    %40 = vector.broadcast %39 : vector<1x8x128xi1> to vector<18x8x128xi1>
    %41 = arith.select %40, %27, %30 : vector<18x8x128xi1>, vector<18x8x128xf32>
    %42 = vector.extract_strided_slice %38 {offsets = [0, 0, 0], sizes = [16, 8, 128], strides = [1, 1, 1]} : vector<18x8x128xf32> to vector<16x8x128xf32>
    %43 = vector.extract_strided_slice %24 {offsets = [0, 0], sizes = [1, 128], strides = [1, 1]} : vector<9x128xf32> to vector<1x128xf32>
    %44 = vector.shape_cast %43 : vector<1x128xf32> to vector<128xf32>
    %45 = vector.shape_cast %44 : vector<128xf32> to vector<1x1x128xf32>
    %46 = vector.broadcast %45 : vector<1x1x128xf32> to vector<16x8x128xf32>
    %47 = arith.mulf %42, %46 : vector<16x8x128xf32>
    %48 = vector.extract_strided_slice %23 {offsets = [0, 0, 0], sizes = [16, 8, 128], strides = [1, 1, 1]} : vector<18x8x128xf32> to vector<16x8x128xf32>
    %49 = vector.extract_strided_slice %24 {offsets = [1, 0], sizes = [1, 128], strides = [1, 1]} : vector<9x128xf32> to vector<1x128xf32>
    %50 = vector.shape_cast %49 : vector<1x128xf32> to vector<128xf32>
    %51 = vector.shape_cast %50 : vector<128xf32> to vector<1x1x128xf32>
    %52 = vector.broadcast %51 : vector<1x1x128xf32> to vector<16x8x128xf32>
    %53 = arith.mulf %48, %52 : vector<16x8x128xf32>
    %54 = arith.addf %47, %53 : vector<16x8x128xf32>
    %55 = vector.extract_strided_slice %41 {offsets = [0, 0, 0], sizes = [16, 8, 128], strides = [1, 1, 1]} : vector<18x8x128xf32> to vector<16x8x128xf32>
    %56 = vector.extract_strided_slice %24 {offsets = [2, 0], sizes = [1, 128], strides = [1, 1]} : vector<9x128xf32> to vector<1x128xf32>
    %57 = vector.shape_cast %56 : vector<1x128xf32> to vector<128xf32>
    %58 = vector.shape_cast %57 : vector<128xf32> to vector<1x1x128xf32>
    %59 = vector.broadcast %58 : vector<1x1x128xf32> to vector<16x8x128xf32>
    %60 = arith.mulf %55, %59 : vector<16x8x128xf32>
    %61 = arith.addf %54, %60 : vector<16x8x128xf32>
    %62 = vector.extract_strided_slice %38 {offsets = [1, 0, 0], sizes = [16, 8, 128], strides = [1, 1, 1]} : vector<18x8x128xf32> to vector<16x8x128xf32>
    %63 = vector.extract_strided_slice %24 {offsets = [3, 0], sizes = [1, 128], strides = [1, 1]} : vector<9x128xf32> to vector<1x128xf32>
    %64 = vector.shape_cast %63 : vector<1x128xf32> to vector<128xf32>
    %65 = vector.shape_cast %64 : vector<128xf32> to vector<1x1x128xf32>
    %66 = vector.broadcast %65 : vector<1x1x128xf32> to vector<16x8x128xf32>
    %67 = arith.mulf %62, %66 : vector<16x8x128xf32>
    %68 = arith.addf %61, %67 : vector<16x8x128xf32>
    %69 = vector.extract_strided_slice %23 {offsets = [1, 0, 0], sizes = [16, 8, 128], strides = [1, 1, 1]} : vector<18x8x128xf32> to vector<16x8x128xf32>
    %70 = vector.extract_strided_slice %24 {offsets = [4, 0], sizes = [1, 128], strides = [1, 1]} : vector<9x128xf32> to vector<1x128xf32>
    %71 = vector.shape_cast %70 : vector<1x128xf32> to vector<128xf32>
    %72 = vector.shape_cast %71 : vector<128xf32> to vector<1x1x128xf32>
    %73 = vector.broadcast %72 : vector<1x1x128xf32> to vector<16x8x128xf32>
    %74 = arith.mulf %69, %73 : vector<16x8x128xf32>
    %75 = arith.addf %68, %74 : vector<16x8x128xf32>
    %76 = vector.extract_strided_slice %41 {offsets = [1, 0, 0], sizes = [16, 8, 128], strides = [1, 1, 1]} : vector<18x8x128xf32> to vector<16x8x128xf32>
    %77 = vector.extract_strided_slice %24 {offsets = [5, 0], sizes = [1, 128], strides = [1, 1]} : vector<9x128xf32> to vector<1x128xf32>
    %78 = vector.shape_cast %77 : vector<1x128xf32> to vector<128xf32>
    %79 = vector.shape_cast %78 : vector<128xf32> to vector<1x1x128xf32>
    %80 = vector.broadcast %79 : vector<1x1x128xf32> to vector<16x8x128xf32>
    %81 = arith.mulf %76, %80 : vector<16x8x128xf32>
    %82 = arith.addf %75, %81 : vector<16x8x128xf32>
    %83 = vector.extract_strided_slice %38 {offsets = [2, 0, 0], sizes = [16, 8, 128], strides = [1, 1, 1]} : vector<18x8x128xf32> to vector<16x8x128xf32>
    %84 = vector.extract_strided_slice %24 {offsets = [6, 0], sizes = [1, 128], strides = [1, 1]} : vector<9x128xf32> to vector<1x128xf32>
    %85 = vector.shape_cast %84 : vector<1x128xf32> to vector<128xf32>
    %86 = vector.shape_cast %85 : vector<128xf32> to vector<1x1x128xf32>
    %87 = vector.broadcast %86 : vector<1x1x128xf32> to vector<16x8x128xf32>
    %88 = arith.mulf %83, %87 : vector<16x8x128xf32>
    %89 = arith.addf %82, %88 : vector<16x8x128xf32>
    %90 = vector.extract_strided_slice %23 {offsets = [2, 0, 0], sizes = [16, 8, 128], strides = [1, 1, 1]} : vector<18x8x128xf32> to vector<16x8x128xf32>
    %91 = vector.extract_strided_slice %24 {offsets = [7, 0], sizes = [1, 128], strides = [1, 1]} : vector<9x128xf32> to vector<1x128xf32>
    %92 = vector.shape_cast %91 : vector<1x128xf32> to vector<128xf32>
    %93 = vector.shape_cast %92 : vector<128xf32> to vector<1x1x128xf32>
    %94 = vector.broadcast %93 : vector<1x1x128xf32> to vector<16x8x128xf32>
    %95 = arith.mulf %90, %94 : vector<16x8x128xf32>
    %96 = arith.addf %89, %95 : vector<16x8x128xf32>
    %97 = vector.extract_strided_slice %41 {offsets = [2, 0, 0], sizes = [16, 8, 128], strides = [1, 1, 1]} : vector<18x8x128xf32> to vector<16x8x128xf32>
    %98 = vector.extract_strided_slice %24 {offsets = [8, 0], sizes = [1, 128], strides = [1, 1]} : vector<9x128xf32> to vector<1x128xf32>
    %99 = vector.shape_cast %98 : vector<1x128xf32> to vector<128xf32>
    %100 = vector.shape_cast %99 : vector<128xf32> to vector<1x1x128xf32>
    %101 = vector.broadcast %100 : vector<1x1x128xf32> to vector<16x8x128xf32>
    %102 = arith.mulf %97, %101 : vector<16x8x128xf32>
    %103 = arith.addf %96, %102 : vector<16x8x128xf32>
    %c0_20 = arith.constant 0 : index
    %c0_21 = arith.constant 0 : index
    %104 = vector.load %arg3[%c0_20, %c0_21] : memref<1x128xf32, #tpu.memory_space<vmem>>, vector<1x128xf32>
    %105 = vector.shape_cast %104 : vector<1x128xf32> to vector<1x1x128xf32>
    %106 = vector.broadcast %105 : vector<1x1x128xf32> to vector<16x8x128xf32>
    %107 = arith.addf %103, %106 : vector<16x8x128xf32>
    %108 = arith.negf %107 : vector<16x8x128xf32>
    %109 = math.exp %108 : vector<16x8x128xf32>
    %cst_22 = arith.constant 1.000000e+00 : f32
    %110 = vector.broadcast %cst_22 : f32 to vector<16x8x128xf32>
    %111 = arith.addf %110, %109 : vector<16x8x128xf32>
    %112 = arith.divf %110, %111 : vector<16x8x128xf32>
    %113 = vector.shape_cast %21 : vector<1x128xf32> to vector<1x1x128xf32>
    %114 = vector.broadcast %113 : vector<1x1x128xf32> to vector<16x8x128xf32>
    %115 = arith.addf %112, %114 : vector<16x8x128xf32>
    %116 = arith.mulf %1, %115 : vector<16x8x128xf32>
    %117 = tpu.concatenate %22, %116, %22 in 0 : vector<1x8x128xf32>, vector<16x8x128xf32>, vector<1x8x128xf32> -> vector<18x8x128xf32>
    %c0_23 = arith.constant 0 : index
    %c0_24 = arith.constant 0 : index
    %118 = vector.load %arg4[%c0_23, %c0_24] : memref<9x128xf32, #tpu.memory_space<vmem>>, vector<9x128xf32>
    %119 = vector.shape_cast %117 : vector<18x8x128xf32> to vector<144x128xf32>
    %c64_i32_25 = arith.constant 64 : i32
    %120 = tpu.dynamic_rotate %119 by %c64_i32_25 dim 1 : vector<144x128xf32>, i32 -> vector<144x128xf32>
    %121 = vector.shape_cast %120 : vector<144x128xf32> to vector<18x8x128xf32>
    %cst_26 = arith.constant 0.000000e+00 : f32
    %122 = vector.broadcast %cst_26 : f32 to vector<18x1x128xf32>
    %123 = vector.extract_strided_slice %121 {offsets = [0, 1, 0], sizes = [18, 7, 128], strides = [1, 1, 1]} : vector<18x8x128xf32> to vector<18x7x128xf32>
    %124 = tpu.concatenate %123, %122 in 1 : vector<18x7x128xf32>, vector<18x1x128xf32> -> vector<18x8x128xf32>
    %125 = vector.extract_strided_slice %121 {offsets = [0, 0, 0], sizes = [18, 7, 128], strides = [1, 1, 1]} : vector<18x8x128xf32> to vector<18x7x128xf32>
    %126 = tpu.concatenate %122, %125 in 1 : vector<18x1x128xf32>, vector<18x7x128xf32> -> vector<18x8x128xf32>
    %127 = tpu.iota {dimensions = array<i32: 1>} : vector<8x128xi32>
    %c64_i32_27 = arith.constant 64 : i32
    %128 = vector.broadcast %c64_i32_27 : i32 to vector<8x128xi32>
    %129 = arith.cmpi slt, %127, %128 : vector<8x128xi32>
    %130 = vector.shape_cast %129 : vector<8x128xi1> to vector<1x8x128xi1>
    %131 = vector.broadcast %130 : vector<1x8x128xi1> to vector<18x8x128xi1>
    %132 = arith.select %131, %126, %121 : vector<18x8x128xi1>, vector<18x8x128xf32>
    %133 = vector.shape_cast %129 : vector<8x128xi1> to vector<1x8x128xi1>
    %134 = vector.broadcast %133 : vector<1x8x128xi1> to vector<18x8x128xi1>
    %135 = arith.select %134, %121, %124 : vector<18x8x128xi1>, vector<18x8x128xf32>
    %136 = vector.extract_strided_slice %132 {offsets = [0, 0, 0], sizes = [16, 8, 128], strides = [1, 1, 1]} : vector<18x8x128xf32> to vector<16x8x128xf32>
    %137 = vector.extract_strided_slice %118 {offsets = [0, 0], sizes = [1, 128], strides = [1, 1]} : vector<9x128xf32> to vector<1x128xf32>
    %138 = vector.shape_cast %137 : vector<1x128xf32> to vector<128xf32>
    %139 = vector.shape_cast %138 : vector<128xf32> to vector<1x1x128xf32>
    %140 = vector.broadcast %139 : vector<1x1x128xf32> to vector<16x8x128xf32>
    %141 = arith.mulf %136, %140 : vector<16x8x128xf32>
    %142 = vector.extract_strided_slice %117 {offsets = [0, 0, 0], sizes = [16, 8, 128], strides = [1, 1, 1]} : vector<18x8x128xf32> to vector<16x8x128xf32>
    %143 = vector.extract_strided_slice %118 {offsets = [1, 0], sizes = [1, 128], strides = [1, 1]} : vector<9x128xf32> to vector<1x128xf32>
    %144 = vector.shape_cast %143 : vector<1x128xf32> to vector<128xf32>
    %145 = vector.shape_cast %144 : vector<128xf32> to vector<1x1x128xf32>
    %146 = vector.broadcast %145 : vector<1x1x128xf32> to vector<16x8x128xf32>
    %147 = arith.mulf %142, %146 : vector<16x8x128xf32>
    %148 = arith.addf %141, %147 : vector<16x8x128xf32>
    %149 = vector.extract_strided_slice %135 {offsets = [0, 0, 0], sizes = [16, 8, 128], strides = [1, 1, 1]} : vector<18x8x128xf32> to vector<16x8x128xf32>
    %150 = vector.extract_strided_slice %118 {offsets = [2, 0], sizes = [1, 128], strides = [1, 1]} : vector<9x128xf32> to vector<1x128xf32>
    %151 = vector.shape_cast %150 : vector<1x128xf32> to vector<128xf32>
    %152 = vector.shape_cast %151 : vector<128xf32> to vector<1x1x128xf32>
    %153 = vector.broadcast %152 : vector<1x1x128xf32> to vector<16x8x128xf32>
    %154 = arith.mulf %149, %153 : vector<16x8x128xf32>
    %155 = arith.addf %148, %154 : vector<16x8x128xf32>
    %156 = vector.extract_strided_slice %132 {offsets = [1, 0, 0], sizes = [16, 8, 128], strides = [1, 1, 1]} : vector<18x8x128xf32> to vector<16x8x128xf32>
    %157 = vector.extract_strided_slice %118 {offsets = [3, 0], sizes = [1, 128], strides = [1, 1]} : vector<9x128xf32> to vector<1x128xf32>
    %158 = vector.shape_cast %157 : vector<1x128xf32> to vector<128xf32>
    %159 = vector.shape_cast %158 : vector<128xf32> to vector<1x1x128xf32>
    %160 = vector.broadcast %159 : vector<1x1x128xf32> to vector<16x8x128xf32>
    %161 = arith.mulf %156, %160 : vector<16x8x128xf32>
    %162 = arith.addf %155, %161 : vector<16x8x128xf32>
    %163 = vector.extract_strided_slice %117 {offsets = [1, 0, 0], sizes = [16, 8, 128], strides = [1, 1, 1]} : vector<18x8x128xf32> to vector<16x8x128xf32>
    %164 = vector.extract_strided_slice %118 {offsets = [4, 0], sizes = [1, 128], strides = [1, 1]} : vector<9x128xf32> to vector<1x128xf32>
    %165 = vector.shape_cast %164 : vector<1x128xf32> to vector<128xf32>
    %166 = vector.shape_cast %165 : vector<128xf32> to vector<1x1x128xf32>
    %167 = vector.broadcast %166 : vector<1x1x128xf32> to vector<16x8x128xf32>
    %168 = arith.mulf %163, %167 : vector<16x8x128xf32>
    %169 = arith.addf %162, %168 : vector<16x8x128xf32>
    %170 = vector.extract_strided_slice %135 {offsets = [1, 0, 0], sizes = [16, 8, 128], strides = [1, 1, 1]} : vector<18x8x128xf32> to vector<16x8x128xf32>
    %171 = vector.extract_strided_slice %118 {offsets = [5, 0], sizes = [1, 128], strides = [1, 1]} : vector<9x128xf32> to vector<1x128xf32>
    %172 = vector.shape_cast %171 : vector<1x128xf32> to vector<128xf32>
    %173 = vector.shape_cast %172 : vector<128xf32> to vector<1x1x128xf32>
    %174 = vector.broadcast %173 : vector<1x1x128xf32> to vector<16x8x128xf32>
    %175 = arith.mulf %170, %174 : vector<16x8x128xf32>
    %176 = arith.addf %169, %175 : vector<16x8x128xf32>
    %177 = vector.extract_strided_slice %132 {offsets = [2, 0, 0], sizes = [16, 8, 128], strides = [1, 1, 1]} : vector<18x8x128xf32> to vector<16x8x128xf32>
    %178 = vector.extract_strided_slice %118 {offsets = [6, 0], sizes = [1, 128], strides = [1, 1]} : vector<9x128xf32> to vector<1x128xf32>
    %179 = vector.shape_cast %178 : vector<1x128xf32> to vector<128xf32>
    %180 = vector.shape_cast %179 : vector<128xf32> to vector<1x1x128xf32>
    %181 = vector.broadcast %180 : vector<1x1x128xf32> to vector<16x8x128xf32>
    %182 = arith.mulf %177, %181 : vector<16x8x128xf32>
    %183 = arith.addf %176, %182 : vector<16x8x128xf32>
    %184 = vector.extract_strided_slice %117 {offsets = [2, 0, 0], sizes = [16, 8, 128], strides = [1, 1, 1]} : vector<18x8x128xf32> to vector<16x8x128xf32>
    %185 = vector.extract_strided_slice %118 {offsets = [7, 0], sizes = [1, 128], strides = [1, 1]} : vector<9x128xf32> to vector<1x128xf32>
    %186 = vector.shape_cast %185 : vector<1x128xf32> to vector<128xf32>
    %187 = vector.shape_cast %186 : vector<128xf32> to vector<1x1x128xf32>
    %188 = vector.broadcast %187 : vector<1x1x128xf32> to vector<16x8x128xf32>
    %189 = arith.mulf %184, %188 : vector<16x8x128xf32>
    %190 = arith.addf %183, %189 : vector<16x8x128xf32>
    %191 = vector.extract_strided_slice %135 {offsets = [2, 0, 0], sizes = [16, 8, 128], strides = [1, 1, 1]} : vector<18x8x128xf32> to vector<16x8x128xf32>
    %192 = vector.extract_strided_slice %118 {offsets = [8, 0], sizes = [1, 128], strides = [1, 1]} : vector<9x128xf32> to vector<1x128xf32>
    %193 = vector.shape_cast %192 : vector<1x128xf32> to vector<128xf32>
    %194 = vector.shape_cast %193 : vector<128xf32> to vector<1x1x128xf32>
    %195 = vector.broadcast %194 : vector<1x1x128xf32> to vector<16x8x128xf32>
    %196 = arith.mulf %191, %195 : vector<16x8x128xf32>
    %197 = arith.addf %190, %196 : vector<16x8x128xf32>
    %c0_28 = arith.constant 0 : index
    %c0_29 = arith.constant 0 : index
    %198 = vector.load %arg7[%c0_28, %c0_29] : memref<128x128xf32, #tpu.memory_space<vmem>>, vector<128x128xf32>
    %c0_30 = arith.constant 0 : index
    %c0_31 = arith.constant 0 : index
    %199 = vector.load %arg8[%c0_30, %c0_31] : memref<128x128xf32, #tpu.memory_space<vmem>>, vector<128x128xf32>
    %c0_32 = arith.constant 0 : index
    %c0_33 = arith.constant 0 : index
    %200 = vector.load %arg9[%c0_32, %c0_33] : memref<1x128xf32, #tpu.memory_space<vmem>>, vector<1x128xf32>
    %201 = vector.shape_cast %197 : vector<16x8x128xf32> to vector<128x128xf32>
    %cst_34 = arith.constant dense<0.000000e+00> : vector<128x128xf32>
    %202 = tpu.matmul %201, %198, %cst_34 {dimension_numbers = #tpu.dot_dimension_numbers<[1], [0], [0], [1], [0, 0, 1, 1], [], []>} : vector<128x128xf32>, vector<128x128xf32>, vector<128x128xf32> -> vector<128x128xf32>
    %203 = vector.shape_cast %1 : vector<16x8x128xf32> to vector<128x128xf32>
    %cst_35 = arith.constant dense<0.000000e+00> : vector<128x128xf32>
    %204 = tpu.matmul %203, %199, %cst_35 {dimension_numbers = #tpu.dot_dimension_numbers<[1], [0], [0], [1], [0, 0, 1, 1], [], []>} : vector<128x128xf32>, vector<128x128xf32>, vector<128x128xf32> -> vector<128x128xf32>
    %205 = arith.addf %202, %204 : vector<128x128xf32>
    %206 = vector.broadcast %200 : vector<1x128xf32> to vector<128x128xf32>
    %207 = arith.addf %205, %206 : vector<128x128xf32>
    %cst_36 = arith.constant 0.000000e+00 : f32
    %cst_37 = arith.constant 6.000000e+00 : f32
    %208 = vector.broadcast %cst_36 : f32 to vector<128x128xf32>
    %209 = arith.maximumf %208, %207 : vector<128x128xf32>
    %210 = vector.broadcast %cst_37 : f32 to vector<128x128xf32>
    %211 = arith.minimumf %210, %209 : vector<128x128xf32>
    %212 = vector.shape_cast %211 : vector<128x128xf32> to vector<16x8x128xf32>
    %c0_38 = arith.constant 0 : index
    %c0_39 = arith.constant 0 : index
    %c0_40 = arith.constant 0 : index
    %c0_41 = arith.constant 0 : index
    %213 = vector.load %arg10[%c0_38, %c0_39, %c0_40, %c0_41] : memref<1x16x8x128xf32, #tpu.memory_space<vmem>>, vector<1x16x8x128xf32>
    %214 = vector.shape_cast %213 : vector<1x16x8x128xf32> to vector<16x8x128xf32>
    %215 = vector.shape_cast %212 : vector<16x8x128xf32> to vector<1x16x8x128xf32>
    tpu.vector_store %arg10[%c0_38, %c0_39, %c0_40, %c0_41], %215 {strides = array<i32>} : memref<1x16x8x128xf32, #tpu.memory_space<vmem>>, vector<1x16x8x128xf32>,
    return
  }
  func.func @transform_0(%arg0: i32) -> (i32, i32, i32, i32) {
    %c0_i32 = arith.constant 0 : i32
    %c0_i32_0 = arith.constant 0 : i32
    %c0_i32_1 = arith.constant 0 : i32
    %c0_i32_2 = arith.constant 0 : i32
    return %arg0, %c0_i32, %c0_i32_0, %c0_i32_1 : i32, i32, i32, i32
  }
  func.func @transform_1(%arg0: i32) -> (i32, i32) {
    %c0_i32 = arith.constant 0 : i32
    %c0_i32_0 = arith.constant 0 : i32
    %c0_i32_1 = arith.constant 0 : i32
    return %c0_i32, %c0_i32_0 : i32, i32
  }
  func.func @transform_2(%arg0: i32) -> (i32, i32) {
    %c0_i32 = arith.constant 0 : i32
    %c0_i32_0 = arith.constant 0 : i32
    %c0_i32_1 = arith.constant 0 : i32
    return %c0_i32, %c0_i32_0 : i32, i32
  }
  func.func @transform_3(%arg0: i32) -> (i32, i32) {
    %c0_i32 = arith.constant 0 : i32
    %c0_i32_0 = arith.constant 0 : i32
    %c0_i32_1 = arith.constant 0 : i32
    return %c0_i32, %c0_i32_0 : i32, i32
  }
  func.func @transform_4(%arg0: i32) -> (i32, i32) {
    %c0_i32 = arith.constant 0 : i32
    %c0_i32_0 = arith.constant 0 : i32
    %c0_i32_1 = arith.constant 0 : i32
    return %c0_i32, %c0_i32_0 : i32, i32
  }
  func.func @transform_5(%arg0: i32) -> (i32, i32) {
    %c0_i32 = arith.constant 0 : i32
    %c0_i32_0 = arith.constant 0 : i32
    %c0_i32_1 = arith.constant 0 : i32
    return %c0_i32, %c0_i32_0 : i32, i32
  }
  func.func @transform_6(%arg0: i32) -> (i32, i32) {
    %c0_i32 = arith.constant 0 : i32
    %c0_i32_0 = arith.constant 0 : i32
    %c0_i32_1 = arith.constant 0 : i32
    return %c0_i32, %c0_i32_0 : i32, i32
  }
  func.func @transform_7(%arg0: i32) -> (i32, i32) {
    %c0_i32 = arith.constant 0 : i32
    %c0_i32_0 = arith.constant 0 : i32
    %c0_i32_1 = arith.constant 0 : i32
    return %c0_i32, %c0_i32_0 : i32, i32
  }
  func.func @transform_8(%arg0: i32) -> (i32, i32) {
    %c0_i32 = arith.constant 0 : i32
    %c0_i32_0 = arith.constant 0 : i32
    %c0_i32_1 = arith.constant 0 : i32
    return %c0_i32, %c0_i32_0 : i32, i32
  }
  func.func @transform_9(%arg0: i32) -> (i32, i32, i32, i32) {
    %c0_i32 = arith.constant 0 : i32
    %c0_i32_0 = arith.constant 0 : i32
    %c0_i32_1 = arith.constant 0 : i32
    %c0_i32_2 = arith.constant 0 : i32
    return %arg0, %c0_i32, %c0_i32_0, %c0_i32_1 : i32, i32, i32, i32
  }
}

</mosaic_0001>

<bundles_post_ra>
// kernel: tile.24
= control target key start
LH: loop header
LB: loop body
LE: loop exit
PB: predicated region body
PF: predicated region fallthrough
CT: control target
= control target key end

     0   :  { %vm48_vm0 = vcmask 1047556   ;;  %vm50_vm1 = vcmask 523264   ;;  %vm65_vm2 = vcmask 1048064   ;;  %s142_s0 = inlined_call_operand.vmem [shape: f32[9,2,64], index: 0, kind: input, shape index: {}]   ;;  %s143_s1 = inlined_call_operand.vmem [shape: f32[9,128], index: 1, kind: output, shape index: {}]  }
   0x1   :  { %v82_v0 = vld [vmem:[%s142_s0 + $0xe] sm:$0x3]  ;;  %v83_v1 = vld [vmem:[%s142_s0 + $0xc] sm:$0x3]  ;;  %v84_v2 = vld [vmem:[%s142_s0 + $0xa] sm:$0x3] }
   0x2   :  { %14 = vst [vmem:[#allocation0 + $0x38] sm:$0x3] %v82_v0  ;;  %19 = vst [vmem:[#allocation0 + $0x30] sm:$0x3] %v83_v1  ;;  %v85_v3 = vld [vmem:[%s142_s0 + $0x8] sm:$0x3] }
   0x3   :  { %24 = vst [vmem:[#allocation0 + $0x28] sm:$0x3] %v84_v2  ;;  %v86_v4 = vld [vmem:[%s142_s0 + $0x6] sm:$0x3]  ;;  %v87_v5 = vld [vmem:[%s142_s0 + $0x4] sm:$0x3] }
   0x4   :  { %29 = vst [vmem:[#allocation0 + $0x20] sm:$0x3] %v85_v3  ;;  %34 = vst [vmem:[#allocation0 + $0x18] sm:$0x3] %v86_v4  ;;  %v88_v6 = vld [vmem:[%s142_s0 + $0x2] sm:$0x3] }
   0x5   :  { %39 = vst [vmem:[#allocation0 + $0x10] sm:$0x3] %v87_v5  ;;  %v44_v7 = vld [vmem:[%s142_s0] sm:$0x3]  ;;  %43 = vst [vmem:[#allocation0 + $0x8] sm:$0x3] %v88_v6 }
   0x6   :  { %45 = vst [vmem:[#allocation0] sm:$0x3] %v44_v7  ;;  %v81_v8 = vld [vmem:[%s142_s0 + $0x10] sm:$0x3]  ;;  %s92_s0 = smov 64  }
   0x7   :  { %9 = vst [vmem:[#allocation0 + $0x40] sm:$0x3] %v81_v8 }
   0xb   :  { %v60_v9 = vld [vmem:[#allocation0 + $0x1] ss:$8 sm:$0xf0]   ;;  %v47_v10 = vld [vmem:[#allocation0] ss:$8 sm:$0xf0]  }
   0xd   :  { %v46_v11 = vld [vmem:[#allocation0] ss:$8 sm:$0xf]   ;;  %v58_v12 = vld [vmem:[#allocation0 + $0x1] ss:$8 sm:$0xf]  }
   0xe   :  { %v62_v13 = vsel %vm48_vm0, %v60_v9, %v58_v12  ;;  %v49_v14 = vsel %vm48_vm0, %v47_v10, %v46_v11  ;;  %v53_v15 = vld [vmem:[#allocation0 + $0x40] sm:$0x1]   ;;  %v68_v16 = vld [vmem:[#allocation0 + $0x41] sm:$0x1]  }
   0xf   :  { %63 = vrot.lane.b32.xlu0 %v62_v13, %s92_s0  ;;  %51 = vst.msk [vmem:[%s143_s1] sm:$0xff] %vm50_vm1, %v49_v14   ;;  %89 = vst.msk [vmem:[%s143_s1 + $0x8] sm:$0x1] %vm50_vm1, %v53_v15  }
  0x13   :  { %69 = vrot.lane.b32.xlu0 %v68_v16, %s92_s0 }
  0x81   :  { %v64_v17 = vpop.permute.xlu0 %63  }
  0x82   :  { %66 = vst.msk [vmem:[%s143_s1] sm:$0xff] %vm65_vm2, %v64_v17  }
  0x85   :  { %v70_v18 = vpop.permute.xlu0 %69  }
  0x86   :  { %90 = vst.msk [vmem:[%s143_s1 + $0x8] sm:$0x1] %vm65_vm2, %v70_v18  }

// kernel: feature_refinement_head.1
= control target key start
LH: loop header
LB: loop body
LE: loop exit
PB: predicated region body
PF: predicated region fallthrough
CT: control target
= control target key end

     0   :  { %s2618_s30 = smov 0   ;;  %s4474_s0 = inlined_call_operand.vmem [shape: f32[2,16,8,128], index: 0, kind: input, shape index: {}]   ;;  %s4475_s1 = inlined_call_operand.vmem [shape: f32[9,128], index: 1, kind: input, shape index: {}]   ;;  %s4476_s2 = inlined_call_operand.vmem [shape: f32[1,128], index: 2, kind: input, shape index: {}]   ;;  %s4477_s3 = inlined_call_operand.vmem [shape: f32[9,128], index: 3, kind: input, shape index: {}]   ;;  %s4478_s4 = inlined_call_operand.vmem [shape: f32[128,128], index: 4, kind: input, shape index: {}]   ;;  %s4479_s5 = inlined_call_operand.vmem [shape: f32[128,128], index: 5, kind: input, shape index: {}]   ;;  %s4480_s6 = inlined_call_operand.vmem [shape: f32[128,128], index: 6, kind: input, shape index: {}]   ;;  %s4481_s7 = inlined_call_operand.vmem [shape: f32[128,128], index: 7, kind: input, shape index: {}]   ;;  %s4482_s8 = inlined_call_operand.vmem [shape: f32[1,128], index: 8, kind: input, shape index: {}]   ;;  %s4483_s9 = inlined_call_operand.vmem [shape: f32[2,16,8,128], index: 9, kind: output, shape index: {}]  }
   0x1 LB: > { %s2147_s10 = sadd.s32 4294967295, %s2563_s30   ;;  %p2151_p0 = scmp.ge.s32.totalorder %s2563_s30, 1  ;;  %s2563_s30 = sphi %s2618_s30, %s19_s30  }
   0x2   : > { %p287_p1 = scmp.lt.s32.totalorder %s2563_s30, 3 }
   0x4   : > { %p288_p2 = pnand %p2151_p0, %p287_p1 }
   0x6   : > { %291 = sbr.rel (%p288_p2) target bundleno = 902 (0x386), region = 56 }
   0xb   : > { %v389_v0 = vld [vmem:[%s4478_s4 + $0x78] sm:$0xff]  ;;  %p323_p3 = scmp.lt.s32.totalorder %s2147_s10, 1  ;;  %v2565_v1 = vmov 0.0   ;;  %v388_v2 = vld [vmem:[%s4478_s4 + $0x70] sm:$0xff]  ;;  %vm2566_vm0 = vmmov 0   ;;  %v387_v3 = vld [vmem:[%s4478_s4 + $0x68] sm:$0xff] }
   0xc   : > { %2279 = vmatprep.subr.mxu0 %v2565_v1  ;;  %2311 = vmatprep.mubr.msk.f32.mxu0 %vm2566_vm0, %v2565_v1  ;;  %v386_v4 = vld [vmem:[%s4478_s4 + $0x60] sm:$0xff]  ;;  %v477_v5 = vld [vmem:[%s4479_s5 + $0x78] sm:$0xff]  ;;  %v476_v6 = vld [vmem:[%s4479_s5 + $0x70] sm:$0xff]  ;;  %s2567_s28 = smov 64   ;;  %vm693_vm1 = vcmask 1040384   ;;  %vm641_vm3 = vcmask 1046528  }
   0xd   : > { %2280 = vmatpush3.msra.mxu0 %v389_v0  ;;  %s4638_s10 = smov (!%p323_p3, %s2147_s10), 1  ;;  %2314 = vmatprep.subr.mxu1 %v2565_v1  ;;  %v385_v10 = vld [vmem:[%s4478_s4 + $0x58] sm:$0xff]  ;;  %v384_v13 = vld [vmem:[%s4478_s4 + $0x50] sm:$0xff]  ;;  %v383_v16 = vld [vmem:[%s4478_s4 + $0x48] sm:$0xff] }
   0xe   : > { %2281 = vmatprep.subr.mxu0 %v2565_v1  ;;  %2346 = vmatprep.mubr.msk.f32.mxu1 %vm2566_vm0, %v2565_v1  ;;  %s2179_s17 = sshll.u32 %s4638_s10, 7  ;;  %v475_v18 = vld [vmem:[%s4479_s5 + $0x68] sm:$0xff]  ;;  %v474_v19 = vld [vmem:[%s4479_s5 + $0x60] sm:$0xff]  ;;  %v473_v23 = vld [vmem:[%s4479_s5 + $0x58] sm:$0xff] }
   0xf   : > { %2282 = vmatpush3.msra.mxu0 %v388_v2  ;;  %s2652_s22 = scalar_lea.vmem %s4474_s0, %s2179_s17  ;;  %2315 = vmatpush3.msra.mxu1 %v477_v5  ;;  %v382_v21 = vld [vmem:[%s4478_s4 + $0x40] sm:$0xff]  ;;  %v381_v25 = vld [vmem:[%s4478_s4 + $0x38] sm:$0xff]  ;;  %v472_v27 = vld [vmem:[%s4479_s5 + $0x50] sm:$0xff]  ;;  %s4439_s25 = scalar_lea.vmem %s4483_s9, %s2179_s17 }
  0x10   : > { %2283 = vmatprep.subr.mxu0 %v2565_v1  ;;  %v2661_v7 = vld [vmem:[%s2652_s22] sm:$0xff]  ;;  %v2664_v8 = vld [vmem:[%s2652_s22 + $0x8] sm:$0xff]  ;;  %v2667_v9 = vld [vmem:[%s2652_s22 + $0x10] sm:$0xff]  ;;  %2316 = vmatprep.subr.mxu1 %v2565_v1 }
  0x11   : > { %2284 = vmatpush3.msra.mxu0 %v387_v3  ;;  %v349_v11 = vadd.f32 %v2664_v8, %v2661_v7  ;;  %v2677_v12 = vld [vmem:[%s2652_s22 + $0x18] sm:$0xff]  ;;  %2317 = vmatpush3.msra.mxu1 %v476_v6  ;;  %v2686_v15 = vld [vmem:[%s2652_s22 + $0x20] sm:$0xff]  ;;  %v2700_v20 = vld [vmem:[%s2652_s22 + $0x28] sm:$0xff] }
  0x12   : > { %2285 = vmatprep.subr.mxu0 %v2565_v1  ;;  %2318 = vmatprep.subr.mxu1 %v2565_v1  ;;  %v2712_v24 = vld [vmem:[%s2652_s22 + $0x30] sm:$0xff]  ;;  %v2724_v28 = vld [vmem:[%s2652_s22 + $0x38] sm:$0xff]  ;;  %v471_v31 = vld [vmem:[%s4479_s5 + $0x48] sm:$0xff] }
  0x13   : > { %2286 = vmatpush3.msra.mxu0 %v386_v4  ;;  %v350_v14 = vadd.f32 %v349_v11, %v2667_v9  ;;  %2319 = vmatpush3.msra.mxu1 %v475_v18  ;;  %v380_v29 = vld [vmem:[%s4478_s4 + $0x30] sm:$0xff]  ;;  %v2736_v32 = vld [vmem:[%s2652_s22 + $0x40] sm:$0xff]  ;;  %v379_v33 = vld [vmem:[%s4478_s4 + $0x28] sm:$0xff] }
  0x14   : > { %2287 = vmatprep.subr.mxu0 %v2565_v1  ;;  %2320 = vmatprep.subr.mxu1 %v2565_v1  ;;  %v470_v35 = vld [vmem:[%s4479_s5 + $0x40] sm:$0xff]  ;;  %v2748_v36 = vld [vmem:[%s2652_s22 + $0x48] sm:$0xff]  ;;  %v469_v39 = vld [vmem:[%s4479_s5 + $0x38] sm:$0xff] }
  0x15   : > { %2288 = vmatpush3.msra.mxu0 %v385_v10  ;;  %v351_v17 = vadd.f32 %v350_v14, %v2677_v12  ;;  %2321 = vmatpush3.msra.mxu1 %v474_v19  ;;  %v378_v37 = vld [vmem:[%s4478_s4 + $0x20] sm:$0xff]  ;;  %v2760_v40 = vld [vmem:[%s2652_s22 + $0x50] sm:$0xff]  ;;  %v377_v41 = vld [vmem:[%s4478_s4 + $0x18] sm:$0xff] }
  0x16   : > { %2289 = vmatprep.subr.mxu0 %v2565_v1  ;;  %2322 = vmatprep.subr.mxu1 %v2565_v1  ;;  %v468_v43 = vld [vmem:[%s4479_s5 + $0x30] sm:$0xff]  ;;  %v2772_v44 = vld [vmem:[%s2652_s22 + $0x58] sm:$0xff]  ;;  %v467_v47 = vld [vmem:[%s4479_s5 + $0x28] sm:$0xff] }
  0x17   : > { %2290 = vmatpush3.msra.mxu0 %v384_v13  ;;  %v352_v22 = vadd.f32 %v351_v17, %v2686_v15  ;;  %2323 = vmatpush3.msra.mxu1 %v473_v23  ;;  %v376_v45 = vld [vmem:[%s4478_s4 + $0x10] sm:$0xff]  ;;  %v2784_v48 = vld [vmem:[%s2652_s22 + $0x60] sm:$0xff]  ;;  %v375_v49 = vld [vmem:[%s4478_s4 + $0x8] sm:$0xff] }
  0x18   : > { %2291 = vmatprep.subr.mxu0 %v2565_v1  ;;  %2324 = vmatprep.subr.mxu1 %v2565_v1  ;;  %v466_v51 = vld [vmem:[%s4479_s5 + $0x20] sm:$0xff]  ;;  %v2796_v52 = vld [vmem:[%s2652_s22 + $0x68] sm:$0xff]  ;;  %v465_v55 = vld [vmem:[%s4479_s5 + $0x18] sm:$0xff] }
  0x19   : > { %2292 = vmatpush3.msra.mxu0 %v383_v16  ;;  %v353_v26 = vadd.f32 %v352_v22, %v2700_v20  ;;  %2325 = vmatpush3.msra.mxu1 %v472_v27  ;;  %v374_v53 = vld [vmem:[%s4478_s4] sm:$0xff]  ;;  %v2808_v56 = vld [vmem:[%s2652_s22 + $0x70] sm:$0xff]  ;;  %v2814_v58 = vld [vmem:[%s2652_s22 + $0x78] sm:$0xff] }
  0x1a   : > { %2293 = vmatprep.subr.mxu0 %v2565_v1  ;;  %2326 = vmatprep.subr.mxu1 %v2565_v1  ;;  %v464_v6 = vld [vmem:[%s4479_s5 + $0x10] sm:$0xff]  ;;  %v463_v10 = vld [vmem:[%s4479_s5 + $0x8] sm:$0xff]  ;;  %v462_v11 = vld [vmem:[%s4479_s5] sm:$0xff] }
  0x1b   : > { %2294 = vmatpush3.msra.mxu0 %v382_v21  ;;  %v354_v30 = vadd.f32 %v353_v26, %v2712_v24  ;;  %2327 = vmatpush3.msra.mxu1 %v471_v31  ;;  %v1213_v14 = vld [vmem:[%s4477_s3] sm:$0xff] }
  0x1c   : > { %2295 = vmatprep.subr.mxu0 %v2565_v1  ;;  %2328 = vmatprep.subr.mxu1 %v2565_v1 }
  0x1d   : > { %2296 = vmatpush3.msra.mxu0 %v381_v25  ;;  %v355_v34 = vadd.f32 %v354_v30, %v2724_v28  ;;  %2329 = vmatpush3.msra.mxu1 %v470_v35 }
  0x1e   : > { %2297 = vmatprep.subr.mxu0 %v2565_v1  ;;  %2330 = vmatprep.subr.mxu1 %v2565_v1 }
  0x1f   : > { %2298 = vmatpush3.msra.mxu0 %v380_v29  ;;  %v356_v38 = vadd.f32 %v355_v34, %v2736_v32  ;;  %2331 = vmatpush3.msra.mxu1 %v469_v39 }
  0x20   : > { %2299 = vmatprep.subr.mxu0 %v2565_v1  ;;  %2332 = vmatprep.subr.mxu1 %v2565_v1 }
  0x21   : > { %2300 = vmatpush3.msra.mxu0 %v379_v33  ;;  %v357_v42 = vadd.f32 %v356_v38, %v2748_v36  ;;  %2333 = vmatpush3.msra.mxu1 %v468_v43 }
  0x22   : > { %2301 = vmatprep.subr.mxu0 %v2565_v1  ;;  %2334 = vmatprep.subr.mxu1 %v2565_v1 }
  0x23   : > { %2302 = vmatpush3.msra.mxu0 %v378_v37  ;;  %v358_v46 = vadd.f32 %v357_v42, %v2760_v40  ;;  %2335 = vmatpush3.msra.mxu1 %v467_v47 }
  0x24   : > { %2303 = vmatprep.subr.mxu0 %v2565_v1  ;;  %2336 = vmatprep.subr.mxu1 %v2565_v1 }
  0x25   : > { %2304 = vmatpush3.msra.mxu0 %v377_v41  ;;  %v359_v50 = vadd.f32 %v358_v46, %v2772_v44  ;;  %2337 = vmatpush3.msra.mxu1 %v466_v51  ;;  %v554_v51 = vld [vmem:[%s4475_s1] sm:$0xff] }
  0x26   : > { %2305 = vmatprep.subr.mxu0 %v2565_v1  ;;  %2338 = vmatprep.subr.mxu1 %v2565_v1 }
  0x27   : > { %2306 = vmatpush3.msra.mxu0 %v376_v45  ;;  %v360_v54 = vadd.f32 %v359_v50, %v2784_v48  ;;  %2339 = vmatpush3.msra.mxu1 %v465_v55 }
  0x28   : > { %2307 = vmatprep.subr.mxu0 %v2565_v1  ;;  %2340 = vmatprep.subr.mxu1 %v2565_v1 }
  0x29   : > { %2308 = vmatpush3.msra.mxu0 %v375_v49  ;;  %v361_v57 = vadd.f32 %v360_v54, %v2796_v52  ;;  %2341 = vmatpush3.msra.mxu1 %v464_v6 }
  0x2a   : > { %2309 = vmatprep.subr.mxu0 %v2565_v1  ;;  %2342 = vmatprep.subr.mxu1 %v2565_v1 }
  0x2b   : > { %2310 = vmatpush3.msra.mxu0 %v374_v53  ;;  %v362_v59 = vadd.f32 %v361_v57, %v2808_v56  ;;  %2343 = vmatpush3.msra.mxu1 %v463_v10 }
  0x2c   : > { %2344 = vmatprep.subr.mxu1 %v2565_v1  ;;  %556 = vrot.lane.b32.xlu0 %v2565_v1, %s2567_s28  ;;  %v711_v1 = vlaneseq }
  0x2d   : > { %v363_v60 = vadd.f32 %v362_v59, %v2814_v58  ;;  %2345 = vmatpush3.msra.mxu1 %v462_v11  ;;  %560 = vrot.lane.b32.xlu1 %v2664_v8, %s2567_s28 }
  0x2e   : > { %v2865_v13 = vshrl.u32 %v711_v1, 7  ;;  %v2871_v17 = vand.u32 127, %v711_v1 }
  0x2f   : > { %v365_v61 = vmul.f32 0.0625, %v363_v60 }
  0x30   : > { %558 = vrot.lane.b32.xlu0 %v2661_v7, %s2567_s28  ;;  %4512 = vst [vmem:[#allocation2_spill] sm:$0xff] %v2865_v13  ;;  %v772_v16 = vsub.s32 1, %v2865_v13  ;;  %v2874_v18 = vsub.s32 0, %v2865_v13  ;;  %v952_v19 = vsub.s32 6, %v2865_v13  ;;  %vm713_vm2 = vcmp.lt.s32.totalorder %v2871_v17, 64 }
  0x31   : > { %v366_v62 = vrot.slane %v365_v61, 4  ;;  %562 = vrot.lane.b32.xlu1 %v2667_v9, %s2567_s28  ;;  %v808_v42 = vsub.s32 2, %v2865_v13  ;;  %v4485_v53 = vsub.s32 3, %v2865_v13  ;;  %v4484_v54 = vsub.s32 5, %v2865_v13 }
  0x32   : > { %4513 = vst [vmem:[#allocation3_spill] sm:$0xff] %v2874_v18  ;;  %v2877_v21 = vrot.slane %v1213_v14, %v772_v16  ;;  %v2880_v25 = vrot.slane %v1213_v14, %v2874_v18  ;;  %v2882_v26 = vrot.slane %v1213_v14, %v952_v19  ;;  %v4487_v55 = vsub.s32 4, %v2865_v13 }
  0x33   : > { %v367_v63 = vadd.f32 %v366_v62, %v365_v61  ;;  %v2898_v43 = vrot.slane %v1213_v14, %v808_v42  ;;  %v2915_v57 = vrot.slane %v554_v51, %v772_v16  ;;  %v2918_v61 = vrot.slane %v554_v51, %v2874_v18 }
  0x34   : > { %564 = vrot.lane.b32.xlu0 %v2677_v12, %s2567_s28  ;;  %4514 = vst [vmem:[#allocation4_spill] sm:$0xff] %v2877_v21  ;;  %4515 = vst [vmem:[#allocation5_spill] sm:$0xff] %v2880_v25  ;;  %v1415_v29 = vmul.f32 0.0, %v2877_v21  ;;  %v2920_v62 = vrot.slane %v554_v51, %v808_v42  ;;  %v2932_v10 = vrot.slane %v554_v51, %v4484_v54 }
  0x35   : > { %v368_v0 = vrot.slane %v367_v63, 2  ;;  %566 = vrot.lane.b32.xlu1 %v2686_v15, %s2567_s28  ;;  %4516 = vst [vmem:[#allocation6_spill] sm:$0xff] %v2882_v26  ;;  %4519 = vst [vmem:[#allocation9_spill] sm:$0xff] %v2898_v43  ;;  %v776_v11 = vmul.f32 %v2915_v57, %v2664_v8  ;;  %v777_v1 = vmul.f32 %v2915_v57, %v2667_v9 }
  0x36   : > { %v2940_v14 = vrot.slane %v554_v51, %v4487_v55  ;;  %v3023_v55 = vmul.f32 %v2915_v57, %v2712_v24  ;;  %v3056_v18 = vmul.f32 %v2915_v57, %v2736_v32 }
  0x37   : > { %v369_v2 = vadd.f32 %v368_v0, %v367_v63  ;;  %v4486_v0 = vsub.s32 7, %v2865_v13 }
  0x38   : > { %568 = vrot.lane.b32.xlu0 %v2700_v20, %s2567_s28  ;;  %4522 = vst [vmem:[#allocation12_spill] sm:$0xff] %v2940_v14 }
  0x39   : > { %v370_v3 = vrot.slane %v369_v2, 1  ;;  %570 = vrot.lane.b32.xlu1 %v2712_v24, %s2567_s28 }
  0x3b   : > { %v371_v4 = vadd.f32 %v370_v3, %v369_v2  ;;  %v774_v3 = vmul.f32 0.0, %v2915_v57 }
  0x3c   : > { %572 = vrot.lane.b32.xlu0 %v2724_v28, %s2567_s28 }
  0x3d   : > { %v373_v5 = vmul.f32 0.125, %v371_v4  ;;  %574 = vrot.lane.b32.xlu1 %v2736_v32, %s2567_s28  ;;  %v2924_v4 = vrot.slane %v554_v51, %v952_v19 }
  0x3f   : > { %2312 = vmatmul.mubr.f32.vlgmr.msra.gmra.mxu0 %v373_v5  ;;  %v2928_v5 = vrot.slane %v554_v51, %v4485_v53 }
  0x40   : > { %2381 = vmatprep.mubr.f32.mxu0 %v2661_v7  ;;  %576 = vrot.lane.b32.xlu0 %v2748_v36, %s2567_s28 }
  0x41   : > { %578 = vrot.lane.b32.xlu1 %v2760_v40, %s2567_s28 }
  0x44   : > { %580 = vrot.lane.b32.xlu0 %v2772_v44, %s2567_s28 }
  0x45   : > { %582 = vrot.lane.b32.xlu1 %v2784_v48, %s2567_s28 }
  0x48   : > { %584 = vrot.lane.b32.xlu0 %v2796_v52, %s2567_s28 }
  0x49   : > { %586 = vrot.lane.b32.xlu1 %v2808_v56, %s2567_s28 }
  0x4c   : > { %588 = vrot.lane.b32.xlu0 %v2814_v58, %s2567_s28 }
  0x9e   : > { %v557_v22 = vpop.permute.xlu0 %556 }
  0x9f   : > { %v659_v23 = vrot.slane %v557_v22, 7  ;;  %v607_v41 = vrot.slane %v557_v22, 1  ;;  %v561_v49 = vpop.permute.xlu1 %560 }
  0xa0   : > { %v661_v59 = vrot.slane %v561_v49, 7  ;;  %v609_v16 = vrot.slane %v561_v49, 1 }
  0xa1   : > { %v694_v27 = vsel %vm693_vm1, 0.0, %v659_v23  ;;  %v642_v45 = vsel %vm641_vm3, %v607_v41, 0.0  ;;  %v775_v23 = vmul.f32 %v2915_v57, %v2661_v7 }
  0xa2   : > { %v2889_v30 = vsel %vm713_vm2, %v694_v27, %v557_v22  ;;  %v2903_v46 = vsel %vm713_vm2, %v557_v22, %v642_v45  ;;  %v559_v2 = vpop.permute.xlu0 %558  ;;  %v696_v19 = vsel %vm693_vm1, 0.0, %v661_v59  ;;  %v2947_v27 = vmul.f32 %v2940_v14, %v2667_v9 }
  0xa3   : > { %4517 = vst [vmem:[#allocation7_spill] sm:$0xff] %v2889_v30  ;;  %v1395_v31 = vmul.f32 %v2880_v25, %v2889_v30  ;;  %v2895_v33 = vmul.f32 %v2882_v26, %v2889_v30  ;;  %4520 = vst [vmem:[#allocation10_spill] sm:$0xff] %v2903_v46  ;;  %v1451_v47 = vmul.f32 %v2898_v43, %v2903_v46  ;;  %v563_v60 = vpop.permute.xlu1 %562  ;;  %v660_v6 = vrot.slane %v559_v2, 7 }
  0xa4   : > { %v662_v63 = vrot.slane %v563_v60, 7  ;;  %v610_v22 = vrot.slane %v563_v60, 1  ;;  %v2967_v41 = vsel %vm713_vm2, %v696_v19, %v561_v49 }
  0xa5   : > { %4518 = vst [vmem:[#allocation8_spill] sm:$0xff] %v2895_v33  ;;  %v1431_v35 = vadd.f32 %v1415_v29, %v1395_v31  ;;  %v2952_v31 = vmul.f32 %v2940_v14, %v2664_v8 }
  0xa6   : > { %v697_v29 = vsel %vm693_vm1, 0.0, %v662_v63  ;;  %v2995_v63 = vmul.f32 %v2940_v14, %v2677_v12  ;;  %v565_v54 = vpop.permute.xlu0 %564 }
  0xa7   : > { %v2907_v50 = vadd.f32 %v1451_v47, %v1431_v35  ;;  %v754_v35 = vmul.f32 %v2918_v61, %v2889_v30  ;;  %v2979_v47 = vmul.f32 %v2915_v57, %v2686_v15  ;;  %v2985_v59 = vsel %vm713_vm2, %v697_v29, %v563_v60 }
  0xa8   : > { %v756_v29 = vmul.f32 %v2918_v61, %v2967_v41  ;;  %v611_v25 = vrot.slane %v565_v54, 1 }
  0xa9   : > { %4521 = vst [vmem:[#allocation11_spill] sm:$0xff] %v2907_v50  ;;  %v790_v19 = vadd.f32 %v774_v3, %v754_v35  ;;  %v757_v3 = vmul.f32 %v2918_v61, %v2985_v59  ;;  %v663_v35 = vrot.slane %v565_v54, 7 }
  0xaa   : > { %v792_v26 = vadd.f32 %v776_v11, %v756_v29  ;;  %v3060_v11 = vmul.f32 %v2915_v57, %v2724_v28  ;;  %v3062_v29 = vpop.permute.xlu1 %566  ;;  %v646_v30 = vsel %vm641_vm3, %v611_v25, 0.0  ;;  %v3104_v25 = vmul.f32 %v2940_v14, %v2748_v36 }
  0xab   : > { %v698_v13 = vsel %vm693_vm1, 0.0, %v663_v35 }
  0xac   : > { %4528 = vst [vmem:[#allocation18_spill] sm:$0xff] %v3104_v25 }
  0xff   : > { %v456_v34 = vpop.f32.mrf.mxu0 }
 0x100   : > { %v460_v37 = vmax.f32 %v456_v34, 0.0  ;;  %v2956_v34 = vrot.slane %v554_v51, %v4486_v0  ;;  %v644_v51 = vsel %vm641_vm3, %v609_v16, 0.0 }
 0x101   : > { %v2313_v38 = vpop.f32.mrf.mxu0  ;;  %v3012_v53 = vsel %vm713_vm2, %v561_v49, %v644_v51  ;;  %v3031_v49 = vmul.f32 %v2940_v14, %v2686_v15  ;;  %v3037_v51 = vmul.f32 %v2940_v14, %v2700_v20 }
 0x102   : > { %v461_v39 = vmin.f32 %v460_v37, 6.0  ;;  %4523 = vst [vmem:[#allocation13_spill] sm:$0xff] %v2956_v34  ;;  %v608_v37 = vrot.slane %v559_v2, 1  ;;  %v695_v38 = vsel %vm693_vm1, 0.0, %v660_v6  ;;  %v2971_v42 = vmul.f32 %v2956_v34, %v2664_v8 }
 0x103   : > { %v2975_v45 = vmul.f32 %v2956_v34, %v2667_v9  ;;  %v2989_v8 = vmul.f32 %v2915_v57, %v2677_v12  ;;  %v717_v9 = vsel %vm713_vm2, %v695_v38, %v559_v2  ;;  %v2999_v6 = vmul.f32 %v2956_v34, %v2677_v12 }
 0x104   : > { %2347 = vmatmul.mubr.f32.vlgmr.msra.gmra.mxu1 %v461_v39  ;;  %v2963_v39 = vmul.f32 %v2940_v14, %v2661_v7  ;;  %v645_v7 = vsel %vm641_vm3, %v610_v22, 0.0  ;;  %v3003_v16 = vmul.f32 %v2956_v34, %v2686_v15  ;;  %v810_v22 = vmul.f32 %v2920_v62, %v2903_v46 }
 0x105   : > { %v643_v38 = vsel %vm641_vm3, %v608_v37, 0.0  ;;  %v3016_v12 = vsel %vm713_vm2, %v563_v60, %v645_v7  ;;  %v755_v0 = vmul.f32 %v2918_v61, %v717_v9  ;;  %v3027_v37 = vmul.f32 %v2915_v57, %v2700_v20 }
 0x106   : > { %v734_v60 = vsel %vm713_vm2, %v559_v2, %v643_v38  ;;  %v3041_v7 = vmul.f32 %v2956_v34, %v2700_v20  ;;  %v3045_v33 = vmul.f32 %v2956_v34, %v2712_v24  ;;  %v812_v15 = vmul.f32 %v2920_v62, %v3012_v53 }
 0x107   : > { %v813_v50 = vmul.f32 %v2920_v62, %v3016_v12  ;;  %v826_v2 = vadd.f32 %v810_v22, %v790_v19  ;;  %v793_v38 = vadd.f32 %v777_v1, %v757_v3  ;;  %v846_v43 = vmul.f32 %v2928_v5, %v717_v9 }
 0x108   : > { %4524 = vst [vmem:[#allocation14_spill] sm:$0xff] %v3045_v33  ;;  %v791_v20 = vadd.f32 %v775_v23, %v755_v0  ;;  %v811_v21 = vmul.f32 %v2920_v62, %v734_v60  ;;  %v3066_v1 = vmul.f32 %v2940_v14, %v2712_v24  ;;  %v3070_v9 = vmul.f32 %v2940_v14, %v2724_v28 }
 0x109   : > { %v3074_v0 = vmul.f32 %v2956_v34, %v2724_v28  ;;  %v3078_v23 = vmul.f32 %v2956_v34, %v2736_v32  ;;  %v828_v19 = vadd.f32 %v812_v15, %v792_v26  ;;  %v848_v22 = vmul.f32 %v2928_v5, %v2985_v59 }
 0x10a   : > { %v664_v3 = vrot.slane %v3062_v29, 7  ;;  %v720_v24 = vsel %vm713_vm2, %v698_v13, %v565_v54  ;;  %v829_v35 = vadd.f32 %v813_v50, %v793_v38  ;;  %v862_v46 = vadd.f32 %v846_v43, %v826_v2 }
 0x10b   : > { %4525 = vst [vmem:[#allocation15_spill] sm:$0xff] %v3074_v0  ;;  %4526 = vst [vmem:[#allocation16_spill] sm:$0xff] %v3078_v23  ;;  %v849_v28 = vmul.f32 %v2928_v5, %v720_v24  ;;  %v847_v0 = vmul.f32 %v2928_v5, %v2967_v41  ;;  %v827_v33 = vadd.f32 %v811_v21, %v791_v20 }
 0x10c   : > { %v3091_v26 = vmul.f32 %v2915_v57, %v2760_v40  ;;  %v3095_v15 = vmul.f32 %v2915_v57, %v2748_v36  ;;  %v758_v13 = vmul.f32 %v2918_v61, %v720_v24  ;;  %v3100_v43 = vmul.f32 %v2940_v14, %v2736_v32 }
 0x10d   : > { %v3108_v21 = vmul.f32 %v2956_v34, %v2748_v36  ;;  %v864_v50 = vadd.f32 %v848_v22, %v828_v19  ;;  %v3112_v2 = vsel %vm713_vm2, %v565_v54, %v646_v30  ;;  %v3116_v38 = vmul.f32 %v2956_v34, %v2760_v40 }
 0x10e   : > { %4527 = vst [vmem:[#allocation17_spill] sm:$0xff] %v3100_v43  ;;  %v3120_v32 = vmul.f32 %v2915_v57, %v2784_v48  ;;  %v898_v20 = vadd.f32 %v2963_v39, %v862_v46  ;;  %v918_v23 = vmul.f32 %v2932_v10, %v734_v60  ;;  %v699_v36 = vsel %vm693_vm1, 0.0, %v664_v3 }
 0x10f   : > { %4529 = vst [vmem:[#allocation19_spill] sm:$0xff] %v3108_v21  ;;  %4530 = vst [vmem:[#allocation20_spill] sm:$0xff] %v3116_v38  ;;  %v865_v21 = vadd.f32 %v849_v28, %v829_v35  ;;  %v863_v19 = vadd.f32 %v847_v0, %v827_v33  ;;  %v3127_v30 = vmul.f32 %v2915_v57, %v2772_v44  ;;  %v612_v3 = vrot.slane %v3062_v29, 1 }
 0x110   : > { %v3131_v54 = vmul.f32 %v2940_v14, %v2760_v40  ;;  %v3135_v22 = vmul.f32 %v2940_v14, %v2772_v44  ;;  %v794_v46 = vadd.f32 %v2989_v8, %v758_v13  ;;  %v814_v39 = vmul.f32 %v2920_v62, %v3112_v2 }
 0x111   : > { %v3142_v33 = vmul.f32 %v2956_v34, %v2772_v44  ;;  %v3146_v60 = vmul.f32 %v2956_v34, %v2784_v48  ;;  %v900_v40 = vadd.f32 %v2947_v27, %v864_v50  ;;  %v920_v0 = vmul.f32 %v2932_v10, %v3016_v12 }
 0x112   : > { %4531 = vst [vmem:[#allocation21_spill] sm:$0xff] %v3131_v54  ;;  %4532 = vst [vmem:[#allocation22_spill] sm:$0xff] %v3135_v22  ;;  %v721_v8 = vsel %vm713_vm2, %v699_v36, %v3062_v29  ;;  %v954_v35 = vmul.f32 %v2924_v4, %v2967_v41  ;;  %v934_v44 = vadd.f32 %v918_v23, %v898_v20  ;;  %v569_v23 = vpop.permute.xlu0 %568 }
 0x113   : > { %4533 = vst [vmem:[#allocation23_spill] sm:$0xff] %v3142_v33  ;;  %4534 = vst [vmem:[#allocation24_spill] sm:$0xff] %v3146_v60  ;;  %v901_v28 = vadd.f32 %v2995_v63, %v865_v21  ;;  %v921_v13 = vmul.f32 %v2932_v10, %v3112_v2  ;;  %v571_v60 = vpop.permute.xlu1 %570  ;;  %v919_v27 = vmul.f32 %v2932_v10, %v3012_v53  ;;  %v665_v22 = vrot.slane %v569_v23, 7 }
 0x114   : > { %v899_v50 = vadd.f32 %v2952_v31, %v863_v19  ;;  %v666_v33 = vrot.slane %v571_v60, 7  ;;  %v3165_v38 = vmul.f32 %v2915_v57, %v2808_v56  ;;  %v850_v36 = vmul.f32 %v2928_v5, %v721_v8 }
 0x115   : > { %v830_v41 = vadd.f32 %v814_v39, %v794_v46  ;;  %v3170_v63 = vmul.f32 %v2915_v57, %v2796_v52  ;;  %v3174_v21 = vmul.f32 %v2940_v14, %v2784_v48  ;;  %v936_v20 = vadd.f32 %v920_v0, %v900_v40 }
 0x116   : > { %4535 = vst [vmem:[#allocation25_spill] sm:$0xff] %v3165_v38  ;;  %v647_v31 = vsel %vm641_vm3, %v612_v3, 0.0  ;;  %v956_v19 = vmul.f32 %v2924_v4, %v720_v24  ;;  %v955_v38 = vmul.f32 %v2924_v4, %v2985_v59  ;;  %v970_v54 = vadd.f32 %v954_v35, %v934_v44  ;;  %v3197_v3 = vld [vmem:[%s4475_s1 + $0x8] ss:$0 sm:$0xff] }
 0x117   : > { %v957_v46 = vmul.f32 %v2924_v4, %v721_v8  ;;  %v937_v39 = vadd.f32 %v921_v13, %v901_v28  ;;  %v935_v25 = vadd.f32 %v919_v27, %v899_v50  ;;  %v759_v57 = vmul.f32 %v2918_v61, %v721_v8 }
 0x118   : > { %v614_v43 = vrot.slane %v571_v60, 1  ;;  %v701_v48 = vsel %vm693_vm1, 0.0, %v666_v33  ;;  %v738_v40 = vsel %vm713_vm2, %v3062_v29, %v647_v31  ;;  %v866_v0 = vadd.f32 %v850_v36, %v830_v41  ;;  %v3212_v41 = vpop.permute.xlu0 %572 }
 0x119   : > { %v3188_v24 = vmul.f32 %v2940_v14, %v2796_v52  ;;  %v3192_v59 = vmul.f32 %v2956_v34, %v2796_v52  ;;  %v972_v8 = vadd.f32 %v956_v19, %v936_v20  ;;  %v613_v33 = vrot.slane %v569_v23, 1 }
 0x11a   : > { %v700_v35 = vsel %vm693_vm1, 0.0, %v665_v22  ;;  %v3202_v29 = vmul.f32 %v2956_v34, %v2808_v56  ;;  %v1026_v44 = vmul.f32 %v3197_v3, %v3012_v53  ;;  %v1006_v28 = vadd.f32 %v2971_v42, %v970_v54 }
 0x11b   : > { %v973_v52 = vadd.f32 %v957_v46, %v937_v39  ;;  %v723_v13 = vsel %vm713_vm2, %v701_v48, %v571_v60  ;;  %v971_v27 = vadd.f32 %v955_v38, %v935_v25  ;;  %v795_v50 = vadd.f32 %v2979_v47, %v759_v57  ;;  %v3234_v57 = vpop.permute.xlu1 %574 }
 0x11c   : > { %v815_v36 = vmul.f32 %v2920_v62, %v738_v40  ;;  %v649_v22 = vsel %vm641_vm3, %v614_v43, 0.0  ;;  %v1027_v20 = vmul.f32 %v3197_v3, %v3016_v12  ;;  %v922_v53 = vmul.f32 %v2932_v10, %v738_v40 }
 0x11d   : > { %v902_v42 = vadd.f32 %v3031_v49, %v866_v0  ;;  %v722_v54 = vsel %vm713_vm2, %v700_v35, %v569_v23  ;;  %v1008_v25 = vadd.f32 %v2999_v6, %v972_v8  ;;  %v1028_v47 = vmul.f32 %v3197_v3, %v3112_v2  ;;  %v3248_v35 = vpop.permute.xlu0 %576 }
 0x11e   : > { %v761_v38 = vmul.f32 %v2918_v61, %v723_v13  ;;  %v648_v43 = vsel %vm641_vm3, %v613_v33, 0.0  ;;  %v1042_v31 = vadd.f32 %v1026_v44, %v1006_v28  ;;  %v1029_v19 = vmul.f32 %v3197_v3, %v738_v40 }
 0x11f   : > { %v1009_v12 = vadd.f32 %v3003_v16, %v973_v52  ;;  %v3229_v49 = vsel %vm713_vm2, %v571_v60, %v649_v22  ;;  %v1007_v46 = vadd.f32 %v2975_v45, %v971_v27  ;;  %v831_v39 = vadd.f32 %v815_v36, %v795_v50  ;;  %v3243_v60 = vld [vmem:[%s4476_s2] ss:$0 sm:$0xff]  ;;  %v1729_v50 = vld [vmem:[%s4481_s7 + $0x70] sm:$0xff] }
 0x120   : > { %v760_v6 = vmul.f32 %v2918_v61, %v722_v54  ;;  %v851_v2 = vmul.f32 %v2928_v5, %v722_v54  ;;  %v938_v48 = vadd.f32 %v922_v53, %v902_v42  ;;  %v739_v0 = vsel %vm713_vm2, %v569_v23, %v648_v43  ;;  %v1713_v42 = vld [vmem:[%s4480_s6 + $0x70] sm:$0xff]  ;;  %v1712_v43 = vld [vmem:[%s4480_s6 + $0x68] sm:$0xff] }
 0x121   : > { %v958_v40 = vmul.f32 %v2924_v4, %v722_v54  ;;  %v668_v16 = vrot.slane %v3234_v57, 7  ;;  %v1044_v45 = vadd.f32 %v1028_v47, %v1008_v25  ;;  %v797_v8 = vadd.f32 %v3023_v55, %v761_v38  ;;  %v1730_v55 = vld [vmem:[%s4481_s7 + $0x78] sm:$0xff] }
 0x122   : > { %v817_v33 = vmul.f32 %v2920_v62, %v3229_v49  ;;  %v3252_v23 = vmul.f32 %v2940_v14, %v2808_v56  ;;  %v3255_v44 = vadd.f32 %v3243_v60, %v1042_v31  ;;  %v1045_v28 = vadd.f32 %v1029_v19, %v1009_v12  ;;  %v1714_v56 = vld [vmem:[%s4480_s6 + $0x78] sm:$0xff]  ;;  %2349 = vmatprep.subr.mxu0 %v1730_v55 }
 0x123   : > { %v616_v52 = vrot.slane %v3234_v57, 1  ;;  %v3260_v27 = vmul.f32 %v2956_v34, %v2814_v58  ;;  %v796_v36 = vadd.f32 %v3027_v37, %v760_v6  ;;  %v816_v22 = vmul.f32 %v2920_v62, %v739_v0  ;;  %2405 = vmatprep.subr.mxu1 %v1714_v56  ;;  %2350 = vmatpush3.msra.mxu0 %v1730_v55  ;;  %v1728_v37 = vld [vmem:[%s4481_s7 + $0x68] sm:$0xff] }
 0x124   : > { %4536 = vst [vmem:[#allocation26_spill] sm:$0xff] %v3255_v44  ;;  %v867_v53 = vadd.f32 %v851_v2, %v831_v39  ;;  %v667_v58 = vrot.slane %v3212_v41, 7  ;;  %v1043_v54 = vadd.f32 %v1027_v20, %v1007_v46  ;;  %v852_v25 = vmul.f32 %v2928_v5, %v723_v13  ;;  %2406 = vmatpush3.msra.mxu1 %v1714_v56 }
 0x125   : > { %v974_v47 = vadd.f32 %v958_v40, %v938_v48  ;;  %v703_v38 = vsel %vm693_vm1, 0.0, %v668_v16  ;;  %v1067_v31 = vadd.f32 %v3243_v60, %v1044_v45  ;;  %v3286_v19 = vadd.f32 %v817_v33, %v797_v8  ;;  %2351 = vmatprep.subr.mxu0 %v1729_v50  ;;  %2407 = vmatprep.subr.mxu1 %v1713_v42  ;;  %v3299_v48 = vpop.permute.xlu1 %578  ;;  %v1727_v40 = vld [vmem:[%s4481_s7 + $0x60] sm:$0xff] }
 0x126   : > { %v3290_v20 = vmul.f32 %v2932_v10, %v3229_v49  ;;  %v615_v12 = vrot.slane %v3212_v41, 1  ;;  %v1068_v46 = vadd.f32 %v3243_v60, %v1045_v28  ;;  %v3295_v39 = vmul.f32 %v2924_v4, %v723_v13  ;;  %2352 = vmatpush3.msra.mxu0 %v1729_v50  ;;  %2408 = vmatpush3.msra.mxu1 %v1713_v42  ;;  %v1711_v16 = vld [vmem:[%s4480_s6 + $0x60] sm:$0xff]  ;;  %v3312_v28 = vpop.permute.xlu0 %580 }
 0x127   : > { %v923_v6 = vmul.f32 %v2932_v10, %v739_v0  ;;  %v651_v2 = vsel %vm641_vm3, %v616_v52, 0.0  ;;  %v832_v45 = vadd.f32 %v816_v22, %v796_v36  ;;  %v903_v13 = vadd.f32 %v3037_v51, %v867_v53  ;;  %2353 = vmatprep.subr.mxu0 %v1728_v37  ;;  %2409 = vmatprep.subr.mxu1 %v1712_v43  ;;  %v1726_v51 = vld [vmem:[%s4481_s7 + $0x58] sm:$0xff] }
 0x128   : > { %v725_v8 = vsel %vm713_vm2, %v703_v38, %v3234_v57  ;;  %v702_v33 = vsel %vm693_vm1, 0.0, %v667_v58  ;;  %v3315_v52 = vadd.f32 %v3243_v60, %v1043_v54  ;;  %v1010_v55 = vadd.f32 %v3041_v7, %v974_v47  ;;  %2354 = vmatpush3.msra.mxu0 %v1728_v37  ;;  %2410 = vmatpush3.msra.mxu1 %v1712_v43  ;;  %v1710_v36 = vld [vmem:[%s4480_s6 + $0x58] sm:$0xff] }
 0x129   : > { %v1030_v50 = vmul.f32 %v3197_v3, %v739_v0  ;;  %v669_v56 = vrot.slane %v3248_v35, 7  ;;  %v3326_v22 = vmul.f32 -1.442695, %v1067_v31  ;;  %v3330_v53 = vmul.f32 %v3197_v3, %v3229_v49  ;;  %2355 = vmatprep.subr.mxu0 %v1727_v40  ;;  %2411 = vmatprep.subr.mxu1 %v1711_v16  ;;  %v1725_v49 = vld [vmem:[%s4481_s7 + $0x50] sm:$0xff] }
 0x12a   : > { %4537 = vst [vmem:[#allocation27_spill] sm:$0xff] %v3315_v52  ;;  %v650_v7 = vsel %vm641_vm3, %v615_v12, 0.0  ;;  %v670_v0 = vrot.slane %v3299_v48, 7  ;;  %v3334_v58 = vmul.f32 -1.442695, %v1068_v46  ;;  %v742_v42 = vsel %vm713_vm2, %v3234_v57, %v651_v2  ;;  %2356 = vmatpush3.msra.mxu0 %v1727_v40  ;;  %2412 = vmatpush3.msra.mxu1 %v1711_v16 }
 0x12b   : > { %4538 = vst [vmem:[#allocation28_spill] sm:$0xff] %v3326_v22  ;;  %v763_v54 = vmul.f32 %v2918_v61, %v725_v8  ;;  %v3343_v47 = vsel %vm713_vm2, %v702_v33, %v3212_v41  ;;  %v3348_v38 = vadd.f32 %v852_v25, %v832_v45  ;;  %v939_v37 = vadd.f32 %v923_v6, %v903_v13  ;;  %v583_v25 = vpop.permute.xlu1 %582  ;;  %v585_v13 = vpop.permute.xlu0 %584 }
 0x12c   : > { %4539 = vst [vmem:[#allocation29_spill] sm:$0xff] %v3334_v58  ;;  %v3351_v43 = vmul.f32 %v2928_v5, %v725_v8  ;;  %v671_v57 = vrot.slane %v3312_v28, 7  ;;  %2357 = vmatprep.subr.mxu0 %v1726_v51  ;;  %2413 = vmatprep.subr.mxu1 %v1710_v36  ;;  %v1046_v31 = vadd.f32 %v1030_v50, %v1010_v55  ;;  %v617_v46 = vrot.slane %v3248_v35, 1 }
 0x12d   : > { %v3357_v12 = vsel %vm713_vm2, %v3212_v41, %v650_v7  ;;  %v704_v2 = vsel %vm693_vm1, 0.0, %v669_v56  ;;  %2358 = vmatpush3.msra.mxu0 %v1726_v51  ;;  %2414 = vmatpush3.msra.mxu1 %v1710_v36  ;;  %v762_v6 = vmul.f32 %v2918_v61, %v3343_v47  ;;  %v618_v40 = vrot.slane %v3299_v48, 1 }
 0x12e   : > { %v705_v16 = vsel %vm693_vm1, 0.0, %v670_v0  ;;  %v672_v45 = vrot.slane %v583_v25, 7  ;;  %2359 = vmatprep.subr.mxu0 %v1725_v49  ;;  %v799_v41 = vadd.f32 %v3056_v18, %v763_v54  ;;  %v819_v33 = vmul.f32 %v2920_v62, %v742_v42 }
 0x12f   : > { %v3368_v55 = vmul.f32 %v2932_v10, %v742_v42  ;;  %v673_v50 = vrot.slane %v585_v13, 7  ;;  %2360 = vmatpush3.msra.mxu0 %v1725_v49  ;;  %v3371_v56 = vmul.f32 %v2924_v4, %v725_v8  ;;  %v3376_v51 = vsel %vm713_vm2, %v704_v2, %v3248_v35 }
 0x130   : > { %v619_v36 = vrot.slane %v3312_v28, 1  ;;  %v706_v7 = vsel %vm693_vm1, 0.0, %v671_v57  ;;  %v3381_v18 = vmul.f32 %v3197_v3, %v742_v42  ;;  %v818_v0 = vmul.f32 %v2920_v62, %v3357_v12 }
 0x131   : > { %v3388_v8 = vsel %vm713_vm2, %v705_v16, %v3299_v48  ;;  %v652_v54 = vsel %vm641_vm3, %v617_v46, 0.0  ;;  %v798_v49 = vadd.f32 %v3060_v11, %v762_v6  ;;  %v653_v2 = vsel %vm641_vm3, %v618_v40, 0.0 }
 0x132   : > { %v620_v34 = vrot.slane %v583_v25, 1  ;;  %v707_v57 = vsel %vm693_vm1, 0.0, %v672_v45  ;;  %v764_v42 = vmul.f32 %v2918_v61, %v3376_v51  ;;  %v3399_v14 = vsel %vm713_vm2, %v706_v7, %v3312_v28 }
 0x133   : > { %v621_v44 = vrot.slane %v585_v13, 1  ;;  %v708_v16 = vsel %vm693_vm1, 0.0, %v673_v50  ;;  %v975_v46 = vadd.f32 %v3295_v39, %v939_v37  ;;  %v765_v11 = vmul.f32 %v2918_v61, %v3388_v8 }
 0x134   : > { %v3408_v6 = vsel %vm713_vm2, %v3248_v35, %v652_v54  ;;  %v654_v40 = vsel %vm641_vm3, %v619_v36, 0.0  ;;  %v3412_v45 = vadd.f32 %v3243_v60, %v1046_v31  ;;  %v853_v7 = vmul.f32 %v2928_v5, %v3343_v47  ;;  %v3428_v31 = vpop.permute.xlu1 %586 }
 0x135   : > { %v3419_v39 = vsel %vm713_vm2, %v3299_v48, %v653_v2  ;;  %v3423_v37 = vsel %vm713_vm2, %v707_v57, %v583_v25  ;;  %v834_v50 = vadd.f32 %v818_v0, %v798_v49  ;;  %v655_v35 = vsel %vm641_vm3, %v620_v34, 0.0 }
 0x136   : > { %v766_v36 = vmul.f32 %v2918_v61, %v3399_v14  ;;  %v3432_v54 = vsel %vm713_vm2, %v708_v16, %v585_v13  ;;  %v800_v52 = vadd.f32 %v3095_v15, %v764_v42  ;;  %v820_v48 = vmul.f32 %v2920_v62, %v3408_v6 }
 0x137   : > { %v3440_v0 = vsel %vm713_vm2, %v3312_v28, %v654_v40  ;;  %v656_v34 = vsel %vm641_vm3, %v621_v44, 0.0  ;;  %v835_v49 = vadd.f32 %v819_v33, %v799_v41  ;;  %v801_v2 = vadd.f32 %v3091_v26, %v765_v11 }
 0x138   : > { %v821_v57 = vmul.f32 %v2920_v62, %v3419_v39  ;;  %v767_v16 = vmul.f32 %v2918_v61, %v3423_v37  ;;  %v869_v15 = vadd.f32 %v853_v7, %v3286_v19  ;;  %v3451_v42 = vsel %vm713_vm2, %v583_v25, %v655_v35 }
 0x139   : > { %v674_v28 = vrot.slane %v3428_v31, 7  ;;  %v768_v44 = vmul.f32 %v2918_v61, %v3432_v54  ;;  %v855_v26 = vmul.f32 %v2928_v5, %v3376_v51  ;;  %v802_v41 = vadd.f32 %v3127_v30, %v766_v36 }
 0x13a   : > { %v822_v33 = vmul.f32 %v2920_v62, %v3440_v0  ;;  %v3463_v19 = vsel %vm713_vm2, %v585_v13, %v656_v34  ;;  %v904_v25 = vadd.f32 %v3066_v1, %v3348_v38  ;;  %v870_v11 = vadd.f32 %v3351_v43, %v834_v50 }
 0x13b   : > { %v856_v40 = vmul.f32 %v2928_v5, %v3388_v8  ;;  %v836_v7 = vadd.f32 %v820_v48, %v800_v52  ;;  %v925_v35 = vmul.f32 %v2932_v10, %v3357_v12  ;;  %v837_v30 = vadd.f32 %v821_v57, %v801_v2  ;;  %v4540_v57 = vld [vmem:[#allocation17_spill] sm:$0xff] }
 0x13c   : > { %v803_v36 = vadd.f32 %v3120_v32, %v767_v16  ;;  %v823_v58 = vmul.f32 %v2920_v62, %v3451_v42  ;;  %v857_v13 = vmul.f32 %v2928_v5, %v3399_v14  ;;  %v709_v1 = vsel %vm693_vm1, 0.0, %v674_v28 }
 0x13d   : > { %v804_v38 = vadd.f32 %v3170_v63, %v768_v44  ;;  %v824_v43 = vmul.f32 %v2920_v62, %v3463_v19  ;;  %v905_v52 = vadd.f32 %v3070_v9, %v869_v15  ;;  %v871_v50 = vadd.f32 %v855_v26, %v835_v49  ;;  %v4541_v15 = vld [vmem:[#allocation14_spill] sm:$0xff] }
 0x13e   : > { %v858_v48 = vmul.f32 %v2928_v5, %v3423_v37  ;;  %v838_v32 = vadd.f32 %v822_v33, %v802_v41  ;;  %v940_v34 = vadd.f32 %v3290_v20, %v904_v25  ;;  %v960_v2 = vmul.f32 %v2924_v4, %v3343_v47  ;;  %v4542_v33 = vld [vmem:[#allocation18_spill] sm:$0xff] }
 0x13f   : > { %v906_v16 = vadd.f32 %v4540_v57, %v870_v11  ;;  %v872_v28 = vadd.f32 %v856_v40, %v836_v7  ;;  %v839_v22 = vadd.f32 %v823_v58, %v803_v36  ;;  %v622_v63 = vrot.slane %v3428_v31, 1  ;;  %v3499_v40 = vpop.permute.xlu0 %588 }
 0x140   : > { %v731_v9 = vsel %vm713_vm2, %v709_v1, %v3428_v31  ;;  %v859_v49 = vmul.f32 %v2928_v5, %v3432_v54  ;;  %v1011_v44 = vadd.f32 %v4541_v15, %v975_v46  ;;  %v873_v26 = vadd.f32 %v857_v13, %v837_v30  ;;  %v4543_v30 = vld [vmem:[#allocation21_spill] sm:$0xff] }
 0x141   : > { %v860_v20 = vmul.f32 %v2928_v5, %v731_v9  ;;  %v840_v41 = vadd.f32 %v824_v43, %v804_v38  ;;  %v941_v47 = vadd.f32 %v925_v35, %v905_v52  ;;  %v907_v25 = vadd.f32 %v4542_v33, %v871_v50  ;;  %v4544_v52 = vld [vmem:[#allocation22_spill] sm:$0xff] }
 0x142   : > { %v927_v58 = vmul.f32 %v2932_v10, %v3408_v6  ;;  %v874_v11 = vadd.f32 %v858_v48, %v838_v32  ;;  %v928_v7 = vmul.f32 %v2932_v10, %v3419_v39  ;;  %v942_v36 = vadd.f32 %v3368_v55, %v906_v16 }
 0x143   : > { %v962_v46 = vmul.f32 %v2924_v4, %v3376_v51  ;;  %v908_v13 = vadd.f32 %v4543_v30, %v872_v28  ;;  %v976_v1 = vadd.f32 %v960_v2, %v940_v34  ;;  %v1032_v35 = vmul.f32 %v3197_v3, %v3357_v12 }
 0x144   : > { %v657_v38 = vsel %vm641_vm3, %v622_v63, 0.0  ;;  %v875_v43 = vadd.f32 %v859_v49, %v839_v22  ;;  %v909_v50 = vadd.f32 %v4544_v52, %v873_v26  ;;  %v929_v48 = vmul.f32 %v2932_v10, %v3440_v0 }
 0x145   : > { %v876_v32 = vadd.f32 %v860_v20, %v840_v41  ;;  %v675_v55 = vrot.slane %v3499_v40, 7  ;;  %v963_v51 = vmul.f32 %v2924_v4, %v3388_v8  ;;  %v943_v57 = vadd.f32 %v927_v58, %v907_v25  ;;  %v4545_v20 = vld [vmem:[#allocation15_spill] sm:$0xff] }
 0x146   : > { %v930_v34 = vmul.f32 %v2932_v10, %v3451_v42  ;;  %v910_v12 = vadd.f32 %v3174_v21, %v874_v11  ;;  %v977_v2 = vadd.f32 %v3371_v56, %v941_v47  ;;  %v978_v22 = vadd.f32 %v962_v46, %v942_v36  ;;  %v4547_v58 = vld [vmem:[#allocation19_spill] sm:$0xff] }
 0x147   : > { %v965_v16 = vmul.f32 %v2924_v4, %v3423_v37  ;;  %v944_v28 = vadd.f32 %v928_v7, %v908_v13  ;;  %v964_v63 = vmul.f32 %v2924_v4, %v3399_v14  ;;  %v748_v8 = vsel %vm713_vm2, %v3428_v31, %v657_v38 }
 0x148   : > { %v911_v49 = vadd.f32 %v3188_v24, %v875_v43  ;;  %v931_v15 = vmul.f32 %v2932_v10, %v3463_v19  ;;  %v945_v21 = vadd.f32 %v929_v48, %v909_v50  ;;  %v932_v56 = vmul.f32 %v2932_v10, %v748_v8  ;;  %v4546_v24 = vld [vmem:[#allocation16_spill] sm:$0xff] }
 0x149   : > { %v912_v26 = vadd.f32 %v3252_v23, %v876_v32  ;;  %v710_v37 = vsel %vm693_vm1, 0.0, %v675_v55  ;;  %v1012_v41 = vadd.f32 %v4545_v20, %v976_v1  ;;  %v979_v47 = vadd.f32 %v963_v51, %v943_v57  ;;  %v4548_v43 = vld [vmem:[#allocation20_spill] sm:$0xff]  ;;  %v4549_v57 = vld [vmem:[#allocation23_spill] sm:$0xff] }
 0x14a   : > { %v946_v14 = vadd.f32 %v930_v34, %v910_v12  ;;  %v966_v33 = vmul.f32 %v2924_v4, %v3432_v54  ;;  %v1047_v31 = vadd.f32 %v3330_v53, %v1011_v44  ;;  %v1013_v25 = vadd.f32 %v4546_v24, %v977_v2  ;;  %v4550_v2 = vld [vmem:[#allocation24_spill] sm:$0xff] }
 0x14b   : > { %v1014_v11 = vadd.f32 %v4547_v58, %v978_v22  ;;  %v1034_v7 = vmul.f32 %v3197_v3, %v3408_v6  ;;  %v980_v36 = vadd.f32 %v964_v63, %v944_v28  ;;  %v967_v23 = vmul.f32 %v2924_v4, %v731_v9  ;;  %v4554_v58 = vld [vmem:[#allocation27_spill] sm:$0xff] }
 0x14c   : > { %v947_v46 = vadd.f32 %v931_v15, %v911_v49  ;;  %v732_v30 = vsel %vm713_vm2, %v710_v37, %v3499_v40  ;;  %v981_v13 = vadd.f32 %v965_v16, %v945_v21  ;;  %v948_v1 = vadd.f32 %v932_v56, %v912_v26  ;;  %v4551_v49 = vld [vmem:[#allocation25_spill] sm:$0xff] }
 0x14d   : > { %v623_v54 = vrot.slane %v3499_v40, 1  ;;  %v968_v53 = vmul.f32 %v2924_v4, %v732_v30  ;;  %v1048_v44 = vadd.f32 %v1032_v35, %v1012_v41  ;;  %v1035_v38 = vmul.f32 %v3197_v3, %v3419_v39 }
 0x14e   : > { %v1015_v6 = vadd.f32 %v4548_v43, %v979_v47  ;;  %v982_v52 = vadd.f32 %v966_v33, %v946_v14  ;;  %v2163_v50 = vmul.f32 -1.442695, %v3412_v45  ;;  %v1049_v48 = vadd.f32 %v3381_v18, %v1013_v25  ;;  %v4552_v47 = vld [vmem:[#allocation28_spill] sm:$0xff] }
 0x14f   : > { %v1050_v32 = vadd.f32 %v1034_v7, %v1014_v11  ;;  %v769_v55 = vmul.f32 %v2918_v61, %v731_v9  ;;  %v1070_v51 = vadd.f32 %v3243_v60, %v1047_v31  ;;  %v1016_v34 = vadd.f32 %v4549_v57, %v980_v36  ;;  %v4553_v31 = vld [vmem:[#allocation29_spill] sm:$0xff] }
 0x150   : > { %v1036_v35 = vmul.f32 %v3197_v3, %v3440_v0  ;;  %v983_v12 = vadd.f32 %v967_v23, %v947_v46  ;;  %v1037_v39 = vmul.f32 %v3197_v3, %v3451_v42  ;;  %v1017_v22 = vadd.f32 %v4550_v2, %v981_v13  ;;  %v4555_v13 = vld [vmem:[#allocation26_spill] sm:$0xff] }
 0x151   : > { %v658_v45 = vsel %vm641_vm3, %v623_v54, 0.0  ;;  %v984_v16 = vadd.f32 %v968_v53, %v948_v1  ;;  %v1071_v18 = vadd.f32 %v3243_v60, %v1048_v44  ;;  %v1051_v28 = vadd.f32 %v1035_v38, %v1015_v6  ;;  %v3586_v54 = vld [vmem:[%s2652_s22 + $0x78] sm:$0xff] }
 0x152   : > { %v1018_v61 = vadd.f32 %v3192_v59, %v982_v52  ;;  %v1038_v9 = vmul.f32 %v3197_v3, %v3463_v19  ;;  %v1072_v63 = vadd.f32 %v3243_v60, %v1049_v48  ;;  %v1073_v0 = vadd.f32 %v3243_v60, %v1050_v32 }
 0x153   : > { %v805_v15 = vadd.f32 %v4551_v49, %v769_v55  ;;  %v825_v42 = vmul.f32 %v2920_v62, %v748_v8  ;;  %v1052_v21 = vadd.f32 %v1036_v35, %v1016_v34  ;;  %v1039_v56 = vmul.f32 %v3197_v3, %v748_v8 }
 0x154   : > { %v1019_v26 = vadd.f32 %v3202_v29, %v983_v12  ;;  %v749_v59 = vsel %vm713_vm2, %v3499_v40, %v658_v45  ;;  %v2164_v37 = vmul.f32 -1.442695, %v1070_v51  ;;  %v1053_v20 = vadd.f32 %v1037_v39, %v1017_v22  ;;  %v4557_v12 = vld [vmem:[#allocation7_spill] sm:$0xff] }
 0x155   : > { %v1020_v19 = vadd.f32 %v3260_v27, %v984_v16  ;;  %v1040_v41 = vmul.f32 %v3197_v3, %v749_v59  ;;  %2472 = vpow2.f32 %v4552_v47  ;;  %v2165_v14 = vmul.f32 -1.442695, %v1071_v18 }
 0x156   : > { %v1074_v62 = vadd.f32 %v3243_v60, %v1051_v28  ;;  %v1054_v33 = vadd.f32 %v1038_v9, %v1018_v61  ;;  %2474 = vpow2.f32 %v4553_v31  ;;  %v2166_v8 = vmul.f32 -1.442695, %v1072_v63  ;;  %v4558_v61 = vld [vmem:[#allocation13_spill] sm:$0xff] }
 0x157   : > { %v841_v29 = vadd.f32 %v825_v42, %v805_v15  ;;  %v861_v24 = vmul.f32 %v2928_v5, %v732_v30  ;;  %2476 = vpow2.f32 %v2163_v50  ;;  %v2167_v40 = vmul.f32 -1.442695, %v1073_v0  ;;  %v4556_v5 = vld [vmem:[#allocation12_spill] sm:$0xff] }
 0x158   : > { %v1075_v25 = vadd.f32 %v3243_v60, %v1052_v21  ;;  %v1055_v27 = vadd.f32 %v1039_v56, %v1019_v26  ;;  %v2160_v11 = vmul.f32 -1.442695, %v4554_v58  ;;  %2478 = vpow2.f32 %v2164_v37  ;;  %v4559_v26 = vld [vmem:[#allocation10_spill] sm:$0xff] }
 0x159   : > { %v1076_v7 = vadd.f32 %v3243_v60, %v1053_v20  ;;  %v1056_v36 = vadd.f32 %v1040_v41, %v1020_v19  ;;  %2480 = vpow2.f32 %v2165_v14  ;;  %v2168_v23 = vmul.f32 -1.442695, %v1074_v62 }
 0x15a   : > { %v1077_v46 = vadd.f32 %v3243_v60, %v1054_v33  ;;  %v2159_v1 = vmul.f32 -1.442695, %v4555_v13  ;;  %2482 = vpow2.f32 %v2166_v8  ;;  %v897_v30 = vmul.f32 %v3586_v54, %v4556_v5 }
 0x15b   : > { %v877_v53 = vadd.f32 %v861_v24, %v841_v29  ;;  %2484 = vpow2.f32 %v2167_v40  ;;  %v2169_v44 = vmul.f32 -1.442695, %v1075_v25  ;;  %v1078_v38 = vadd.f32 %v3243_v60, %v1055_v27 }
 0x15c   : > { %2486 = vpow2.f32 %v2160_v11  ;;  %v2170_v43 = vmul.f32 -1.442695, %v1076_v7  ;;  %v1079_v6 = vadd.f32 %v3243_v60, %v1056_v36  ;;  %v2171_v52 = vmul.f32 -1.442695, %v1077_v46 }
 0x15d   : > { %2488 = vpow2.f32 %v2168_v23  ;;  %v913_v50 = vadd.f32 %v897_v30, %v877_v53  ;;  %v933_v48 = vmul.f32 %v2932_v10, %v749_v59  ;;  %v2172_v32 = vmul.f32 -1.442695, %v1078_v38 }
 0x15e   : > { %2490 = vpow2.f32 %v2159_v1  ;;  %v2173_v51 = vmul.f32 -1.442695, %v1079_v6  ;;  %v969_v39 = vmul.f32 %v2924_v4, %v4557_v12  ;;  %v1005_v9 = vmul.f32 0.0, %v4558_v61  ;;  %v1724_v6 = vld [vmem:[%s4481_s7 + $0x48] sm:$0xff] }
 0x15f   : > { %2492 = vpow2.f32 %v2169_v44  ;;  %v949_v2 = vadd.f32 %v933_v48, %v913_v50  ;;  %v1041_v59 = vmul.f32 %v3197_v3, %v4559_v26  ;;  %2361 = vmatprep.subr.mxu0 %v1724_v6 }
 0x160   : > { %2494 = vpow2.f32 %v2170_v43  ;;  %2362 = vmatpush3.msra.mxu0 %v1724_v6 }
 0x161   : > { %2496 = vpow2.f32 %v2171_v52  ;;  %v985_v63 = vadd.f32 %v969_v39, %v949_v2  ;;  %v1709_v52 = vld [vmem:[%s4480_s6 + $0x50] sm:$0xff] }
 0x162   : > { %v2473_v35 = vpop.eup %2472  ;;  %2415 = vmatprep.subr.mxu1 %v1709_v52 }
 0x163   : > { %v2475_v22 = vpop.eup %2474  ;;  %v1131_v10 = vadd.f32 1.0, %v2473_v35  ;;  %v1021_v20 = vadd.f32 %v1005_v9, %v985_v63  ;;  %2416 = vmatpush3.msra.mxu1 %v1709_v52  ;;  %v2542_v9 = vld [vmem:[%s2652_s22] sm:$0xff]  ;;  %v1720_v52 = vld [vmem:[%s4481_s7 + $0x28] sm:$0xff] }
 0x164   : > { %v2477_v45 = vpop.eup %2476  ;;  %v1132_v28 = vadd.f32 1.0, %v2475_v22 }
 0x165   : > { %v2479_v16 = vpop.eup %2478  ;;  %v1133_v49 = vadd.f32 1.0, %v2477_v45  ;;  %v1057_v8 = vadd.f32 %v1041_v59, %v1021_v20  ;;  %v4561_v59 = vld [vmem:[#allocation4_spill] sm:$0xff] }
 0x166   : > { %v2481_v18 = vpop.eup %2480  ;;  %v1134_v42 = vadd.f32 1.0, %v2479_v16  ;;  %v1722_v16 = vld [vmem:[%s4481_s7 + $0x38] sm:$0xff]  ;;  %v3652_v20 = vld [vmem:[%s2652_s22 + $0x10] sm:$0xff] }
 0x167   : > { %v2483_v0 = vpop.eup %2482  ;;  %v1135_v4 = vadd.f32 1.0, %v2481_v18  ;;  %v1080_v7 = vadd.f32 %v3243_v60, %v1057_v8 }
 0x168   : > { %v2485_v15 = vpop.eup %2484  ;;  %v1136_v37 = vadd.f32 1.0, %v2483_v0 }
 0x169   : > { %v2487_v21 = vpop.eup %2486  ;;  %v1137_v41 = vadd.f32 1.0, %v2485_v15  ;;  %v2174_v13 = vmul.f32 -1.442695, %v1080_v7 }
 0x16a   : > { %v2489_v56 = vpop.eup %2488  ;;  %v1130_v14 = vadd.f32 1.0, %v2487_v21 }
 0x16b   : > { %v2491_v19 = vpop.eup %2490  ;;  %v1138_v33 = vadd.f32 1.0, %v2489_v56 }
 0x16c   : > { %v2493_v47 = vpop.eup %2492  ;;  %v1129_v24 = vadd.f32 1.0, %v2491_v19 }
 0x16d   : > { %v2495_v62 = vpop.eup %2494  ;;  %v1139_v3 = vadd.f32 1.0, %v2493_v47  ;;  %v1721_v47 = vld [vmem:[%s4481_s7 + $0x30] sm:$0xff] }
 0x16e   : > { %v2497_v31 = vpop.eup %2496  ;;  %v1140_v58 = vadd.f32 1.0, %v2495_v62 }
 0x16f   : > { %v1141_v11 = vadd.f32 1.0, %v2497_v31 }
 0x1c4   : > { %v544_v55 = vpop.f32.mrf.mxu1 }
 0x1c5   : > { %v2156_v57 = vmul.f32 -1.442695, %v544_v55 }
 0x1c6   : > { %v2348_v34 = vpop.f32.mrf.mxu1 }
 0x1c7   : > { %2498 = vpow2.f32 %v2156_v57  ;;  %v1708_v57 = vld [vmem:[%s4480_s6 + $0x48] sm:$0xff] }
 0x1c8   : > { %2500 = vpow2.f32 %v2172_v32  ;;  %v4560_v32 = vld [vmem:[#allocation3_spill] sm:$0xff]  ;;  %2417 = vmatprep.subr.mxu1 %v1708_v57 }
 0x1c9   : > { %2502 = vpow2.f32 %v2173_v51  ;;  %v1723_v51 = vld [vmem:[%s4481_s7 + $0x40] sm:$0xff]  ;;  %2418 = vmatpush3.msra.mxu1 %v1708_v57 }
 0x1ca   : > { %2504 = vrcp.f32 %v1131_v10  ;;  %2363 = vmatprep.subr.mxu0 %v1723_v51  ;;  %v1707_v10 = vld [vmem:[%s4480_s6 + $0x40] sm:$0xff] }
 0x1cb   : > { %2506 = vrcp.f32 %v1132_v28  ;;  %2364 = vmatpush3.msra.mxu0 %v1723_v51  ;;  %v3625_v28 = vld [vmem:[%s2652_s22 + $0x8] sm:$0xff]  ;;  %2419 = vmatprep.subr.mxu1 %v1707_v10 }
 0x1cc   : > { %2508 = vrcp.f32 %v1133_v49  ;;  %2365 = vmatprep.subr.mxu0 %v1722_v16  ;;  %2420 = vmatpush3.msra.mxu1 %v1707_v10 }
 0x1cd   : > { %2510 = vrcp.f32 %v1134_v42  ;;  %v3636_v42 = vld [vmem:[%s2652_s22 + $0x18] sm:$0xff]  ;;  %2366 = vmatpush3.msra.mxu0 %v1722_v16 }
 0x1ce   : > { %2512 = vrcp.f32 %v1135_v4  ;;  %2367 = vmatprep.subr.mxu0 %v1721_v47 }
 0x1cf   : > { %2514 = vrcp.f32 %v1136_v37  ;;  %2368 = vmatpush3.msra.mxu0 %v1721_v47  ;;  %v1703_v47 = vld [vmem:[%s4480_s6 + $0x20] sm:$0xff] }
 0x1d0   : > { %2516 = vrcp.f32 %v1137_v41  ;;  %2369 = vmatprep.subr.mxu0 %v1720_v52 }
 0x1d1   : > { %2518 = vrcp.f32 %v1130_v14  ;;  %2370 = vmatpush3.msra.mxu0 %v1720_v52 }
 0x1d2   : > { %2520 = vrcp.f32 %v1138_v33 }
 0x1d4   : > { %v2499_v29 = vpop.eup %2498 }
 0x1d5   : > { %v2501_v40 = vpop.eup %2500  ;;  %v551_v25 = vadd.f32 1.0, %v2499_v29  ;;  %v3666_v29 = vld [vmem:[%s2652_s22 + $0x28] sm:$0xff] }
 0x1d6   : > { %v2503_v27 = vpop.eup %2502  ;;  %v1142_v36 = vadd.f32 1.0, %v2501_v40  ;;  %v3672_v40 = vld [vmem:[%s2652_s22 + $0x20] sm:$0xff] }
 0x1d7   : > { %2522 = vrcp.f32 %v551_v25  ;;  %v1143_v23 = vadd.f32 1.0, %v2503_v27  ;;  %v2505_v46 = vpop.eup %2504 }
 0x1d8   : > { %2524 = vrcp.f32 %v1129_v24  ;;  %v2507_v1 = vpop.eup %2506 }
 0x1d9   : > { %2526 = vrcp.f32 %v1139_v3  ;;  %v2509_v5 = vpop.eup %2508 }
 0x1da   : > { %2528 = vrcp.f32 %v1140_v58  ;;  %v2511_v30 = vpop.eup %2510  ;;  %v1706_v58 = vld [vmem:[%s4480_s6 + $0x38] sm:$0xff] }
 0x1db   : > { %2530 = vrcp.f32 %v1141_v11  ;;  %v2513_v53 = vpop.eup %2512  ;;  %v3683_v11 = vld [vmem:[%s2652_s22 + $0x38] sm:$0xff]  ;;  %2421 = vmatprep.subr.mxu1 %v1706_v58 }
 0x1dc   : > { %2532 = vrcp.f32 %v1142_v36  ;;  %v2515_v44 = vpop.eup %2514  ;;  %v3689_v36 = vld [vmem:[%s2652_s22 + $0x30] sm:$0xff]  ;;  %2422 = vmatpush3.msra.mxu1 %v1706_v58 }
 0x1dd   : > { %2534 = vrcp.f32 %v1143_v23  ;;  %v2517_v38 = vpop.eup %2516 }
 0x1de   : > { %2536 = vpow2.f32 %v2174_v13  ;;  %v2519_v43 = vpop.eup %2518 }
 0x1df   : > { %v2521_v60 = vpop.eup %2520 }
 0x1e4   : > { %v2523_v50 = vpop.eup %2522 }
 0x1e5   : > { %v2525_v48 = vpop.eup %2524  ;;  %v3606_v55 = vrot.slane %v2523_v50, %v4560_v32  ;;  %v1705_v50 = vld [vmem:[%s4480_s6 + $0x30] sm:$0xff] }
 0x1e6   : > { %v2527_v34 = vpop.eup %2526  ;;  %2423 = vmatprep.subr.mxu1 %v1705_v50 }
 0x1e7   : > { %v2529_v35 = vpop.eup %2528  ;;  %v1182_v12 = vadd.f32 %v2519_v43, %v3606_v55  ;;  %v1181_v39 = vadd.f32 %v2525_v48, %v3606_v55  ;;  %v1184_v2 = vadd.f32 %v2507_v1, %v3606_v55  ;;  %v1183_v22 = vadd.f32 %v2505_v46, %v3606_v55  ;;  %v3695_v46 = vld [vmem:[%s2652_s22 + $0x48] sm:$0xff]  ;;  %v3701_v1 = vld [vmem:[%s2652_s22 + $0x40] sm:$0xff]  ;;  %2424 = vmatpush3.msra.mxu1 %v1705_v50 }
 0x1e8   : > { %v2531_v45 = vpop.eup %2530  ;;  %v1186_v0 = vadd.f32 %v2511_v30, %v3606_v55  ;;  %v1185_v49 = vadd.f32 %v2509_v5, %v3606_v55  ;;  %v1188_v4 = vadd.f32 %v2515_v44, %v3606_v55  ;;  %v1187_v56 = vadd.f32 %v2513_v53, %v3606_v55  ;;  %v3711_v30 = vld [vmem:[%s2652_s22 + $0x58] sm:$0xff]  ;;  %v3717_v44 = vld [vmem:[%s2652_s22 + $0x50] sm:$0xff]  ;;  %v3723_v43 = vld [vmem:[%s2652_s22 + $0x68] sm:$0xff] }
 0x1e9   : > { %v2533_v18 = vpop.eup %2532  ;;  %v3628_v61 = vmul.f32 %v3625_v28, %v1182_v12  ;;  %v3631_v63 = vmul.f32 %v2542_v9, %v1181_v39  ;;  %v3639_v21 = vmul.f32 %v3636_v42, %v1184_v2  ;;  %v3655_v19 = vmul.f32 %v3652_v20, %v1183_v22  ;;  %v3735_v48 = vld [vmem:[%s2652_s22 + $0x60] sm:$0xff] }
 0x1ea   : > { %v2535_v15 = vpop.eup %2534  ;;  %v1190_v41 = vadd.f32 %v2521_v60, %v3606_v55  ;;  %v1189_v62 = vadd.f32 %v2517_v38, %v3606_v55  ;;  %v1192_v33 = vadd.f32 %v2529_v35, %v3606_v55  ;;  %v1191_v31 = vadd.f32 %v2527_v34, %v3606_v55  ;;  %v3753_v35 = vld [vmem:[%s2652_s22 + $0x70] sm:$0xff]  ;;  %v1719_v22 = vld [vmem:[%s4481_s7 + $0x20] sm:$0xff] }
 0x1eb   : > { %1217 = vrot.lane.b32.xlu0 %v3628_v61, %s2567_s28  ;;  %1215 = vrot.lane.b32.xlu1 %v3631_v63, %s2567_s28  ;;  %v3649_v37 = vmul.f32 %v4561_v59, %v3631_v63  ;;  %v2537_v14 = vpop.eup %2536  ;;  %v1194_v8 = vadd.f32 %v2533_v18, %v3606_v55  ;;  %v3669_v24 = vmul.f32 %v3666_v29, %v1186_v0 }
 0x1ec   : > { %v3675_v3 = vmul.f32 %v3672_v40, %v1185_v49  ;;  %v1193_v25 = vadd.f32 %v2531_v45, %v3606_v55  ;;  %v1195_v27 = vadd.f32 %v2535_v15, %v3606_v55  ;;  %v3686_v7 = vmul.f32 %v3683_v11, %v1188_v4  ;;  %v1704_v45 = vld [vmem:[%s4480_s6 + $0x28] sm:$0xff]  ;;  %2371 = vmatprep.subr.mxu0 %v1719_v22 }
 0x1ed   : > { %v3692_v23 = vmul.f32 %v3689_v36, %v1187_v56  ;;  %v3698_v13 = vmul.f32 %v3695_v46, %v1190_v41  ;;  %v3704_v5 = vmul.f32 %v3701_v1, %v1189_v62  ;;  %v3714_v53 = vmul.f32 %v3711_v30, %v1192_v33  ;;  %2425 = vmatprep.subr.mxu1 %v1704_v45  ;;  %v1718_v41 = vld [vmem:[%s4481_s7 + $0x18] sm:$0xff]  ;;  %v1716_v62 = vld [vmem:[%s4481_s7 + $0x8] sm:$0xff]  ;;  %v1701_v33 = vld [vmem:[%s4480_s6 + $0x10] sm:$0xff] }
 0x1ee   : > { %v3720_v38 = vmul.f32 %v3717_v44, %v1191_v31  ;;  %v3726_v60 = vmul.f32 %v3723_v43, %v1194_v8  ;;  %v1144_v6 = vadd.f32 1.0, %v2537_v14  ;;  %v3738_v32 = vmul.f32 %v3735_v48, %v1193_v25  ;;  %2372 = vmatpush3.msra.mxu0 %v1719_v22  ;;  %2426 = vmatpush3.msra.mxu1 %v1704_v45  ;;  %v1702_v14 = vld [vmem:[%s4480_s6 + $0x18] sm:$0xff]  ;;  %v1715_v31 = vld [vmem:[%s4481_s7] sm:$0xff]  ;;  %v1700_v8 = vld [vmem:[%s4480_s6 + $0x8] sm:$0xff] }
 0x1ef   : > { %1221 = vrot.lane.b32.xlu0 %v3639_v21, %s2567_s28  ;;  %1219 = vrot.lane.b32.xlu1 %v3655_v19, %s2567_s28  ;;  %v3742_v51 = vmul.f32 %v4561_v59, %v3628_v61  ;;  %v3746_v57 = vmul.f32 %v4561_v59, %v3639_v21  ;;  %v3750_v34 = vmul.f32 %v4561_v59, %v3655_v19 }
 0x1f0   : > { %4562 = vst [vmem:[#allocation17_spill] sm:$0xff] %v3726_v60  ;;  %v3756_v12 = vmul.f32 %v3753_v35, %v1195_v27  ;;  %v3760_v39 = vmul.f32 %v4561_v59, %v3669_v24  ;;  %v3764_v2 = vmul.f32 %v4561_v59, %v3675_v3  ;;  %v3774_v16 = vmul.f32 %v4561_v59, %v3686_v7 }
 0x1f1   : > { %v3778_v10 = vmul.f32 %v4561_v59, %v3692_v23  ;;  %v3782_v18 = vmul.f32 %v4561_v59, %v3698_v13  ;;  %2538 = vrcp.f32 %v1144_v6  ;;  %v3790_v9 = vmul.f32 %v4561_v59, %v3704_v5  ;;  %2373 = vmatprep.subr.mxu0 %v1718_v41  ;;  %2427 = vmatprep.subr.mxu1 %v1703_v47 }
 0x1f2   : > { %v3794_v0 = vmul.f32 %v4561_v59, %v3714_v53  ;;  %v3798_v49 = vmul.f32 %v4561_v59, %v3720_v38  ;;  %v3802_v15 = vmul.f32 %v4561_v59, %v3726_v60  ;;  %v3806_v4 = vmul.f32 %v4561_v59, %v3738_v32  ;;  %2374 = vmatpush3.msra.mxu0 %v1718_v41 }
 0x1f3   : > { %1225 = vrot.lane.b32.xlu0 %v3669_v24, %s2567_s28  ;;  %1223 = vrot.lane.b32.xlu1 %v3675_v3, %s2567_s28  ;;  %v3810_v56 = vmul.f32 %v4561_v59, %v3756_v12  ;;  %v1717_v59 = vld [vmem:[%s4481_s7 + $0x10] sm:$0xff] }
 0x1f4   : > { %2428 = vmatpush3.msra.mxu1 %v1703_v47  ;;  %2375 = vmatprep.subr.mxu0 %v1717_v59 }
 0x1f5   : > { %4563 = vst [vmem:[#allocation14_spill] sm:$0xff] %v3810_v56  ;;  %2429 = vmatprep.subr.mxu1 %v1702_v14  ;;  %2376 = vmatpush3.msra.mxu0 %v1717_v59 }
 0x1f6   : > { %2430 = vmatpush3.msra.mxu1 %v1702_v14  ;;  %2377 = vmatprep.subr.mxu0 %v1716_v62 }
 0x1f7   : > { %1229 = vrot.lane.b32.xlu0 %v3686_v7, %s2567_s28  ;;  %1227 = vrot.lane.b32.xlu1 %v3692_v23, %s2567_s28 }
 0x1f8   : > { %2431 = vmatprep.subr.mxu1 %v1701_v33  ;;  %2378 = vmatpush3.msra.mxu0 %v1716_v62 }
 0x1f9   : > { %2432 = vmatpush3.msra.mxu1 %v1701_v33  ;;  %2379 = vmatprep.subr.mxu0 %v1715_v31 }
 0x1fa   : > { %2433 = vmatprep.subr.mxu1 %v1700_v8  ;;  %2380 = vmatpush3.msra.mxu0 %v1715_v31 }
 0x1fb   : > { %1233 = vrot.lane.b32.xlu0 %v3698_v13, %s2567_s28  ;;  %1231 = vrot.lane.b32.xlu1 %v3704_v5, %s2567_s28 }
 0x1fc   : > { %2434 = vmatpush3.msra.mxu1 %v1700_v8  ;;  %2382 = vmatmul.mubr.f32.vlgmr.msra.gmra.mxu0 %v3625_v28  ;;  %v2556_v28 = vld [vmem:[%s4477_s3] sm:$0xff] }
 0x1fd   : > { %2384 = vmatprep.mubr.f32.mxu0 %v3652_v20  ;;  %v4603_v17 = vld [vmem:[#allocation14_spill] sm:$0xff] }
 0x1fe   : > { %v2539_v25 = vpop.eup %2538 }
 0x1ff   : > { %1237 = vrot.lane.b32.xlu0 %v3714_v53, %s2567_s28  ;;  %1235 = vrot.lane.b32.xlu1 %v3720_v38, %s2567_s28  ;;  %v1196_v27 = vadd.f32 %v2539_v25, %v3606_v55  ;;  %v1699_v55 = vld [vmem:[%s4480_s6] sm:$0xff] }
 0x200   : > { %2385 = vmatmul.mubr.f32.gmra.mxu0 %v3636_v42  ;;  %2435 = vmatprep.subr.mxu1 %v1699_v55  ;;  %v4564_v42 = vld [vmem:[#allocation2_spill] sm:$0xff] }
 0x201   : > { %v3855_v58 = vmul.f32 %v3586_v54, %v1196_v27  ;;  %2387 = vmatprep.mubr.f32.mxu0 %v3672_v40  ;;  %2436 = vmatpush3.msra.mxu1 %v1699_v55  ;;  %v4565_v20 = vsub.s32 4, %v4564_v42  ;;  %v4566_v40 = vsub.s32 7, %v4564_v42 }
 0x203   : > { %1241 = vrot.lane.b32.xlu0 %v3726_v60, %s2567_s28  ;;  %1239 = vrot.lane.b32.xlu1 %v3738_v32, %s2567_s28 }
 0x204   : > { %2388 = vmatmul.mubr.f32.gmra.mxu0 %v3666_v29  ;;  %v1522_v29 = vrot.slane %v2556_v28, %v4565_v20 }
 0x205   : > { %2390 = vmatprep.mubr.f32.mxu0 %v3689_v36 }
 0x206   : > { %v3888_v36 = vmul.f32 %v1522_v29, %v3631_v63  ;;  %v3913_v52 = vmul.f32 %v1522_v29, %v3655_v19  ;;  %v3930_v22 = vmul.f32 %v1522_v29, %v3756_v12  ;;  %v3947_v47 = vmul.f32 %v1522_v29, %v3692_v23 }
 0x207   : > { %1245 = vrot.lane.b32.xlu0 %v3855_v58, %s2567_s28  ;;  %1243 = vrot.lane.b32.xlu1 %v3756_v12, %s2567_s28  ;;  %v3961_v33 = vmul.f32 %v1522_v29, %v3704_v5  ;;  %v3968_v31 = vmul.f32 %v1522_v29, %v3698_v13 }
 0x208   : > { %2391 = vmatmul.mubr.f32.gmra.mxu0 %v3683_v11  ;;  %v3885_v11 = vrot.slane %v2556_v28, %v4566_v40  ;;  %4571 = vst [vmem:[#allocation22_spill] sm:$0xff] %v3930_v22  ;;  %4574 = vst [vmem:[#allocation19_spill] sm:$0xff] %v3947_v47 }
 0x209   : > { %2393 = vmatprep.mubr.f32.mxu0 %v3701_v1  ;;  %4578 = vst [vmem:[#allocation25_spill] sm:$0xff] %v3961_v33  ;;  %4580 = vst [vmem:[#allocation29_spill] sm:$0xff] %v3968_v31 }
 0x20a   : > { %4567 = vst [vmem:[#allocation18_spill] sm:$0xff] %v3885_v11  ;;  %v3906_v6 = vmul.f32 %v3885_v11, %v3628_v61  ;;  %v3910_v63 = vmul.f32 %v3885_v11, %v3655_v19  ;;  %v3917_v50 = vmul.f32 %v3885_v11, %v3639_v21  ;;  %v3933_v19 = vmul.f32 %v1522_v29, %v3675_v3 }
 0x20b   : > { %v3937_v45 = vmul.f32 %v3885_v11, %v3669_v24  ;;  %v3944_v41 = vmul.f32 %v3885_v11, %v3692_v23  ;;  %v3951_v59 = vmul.f32 %v3885_v11, %v3686_v7  ;;  %v3965_v23 = vmul.f32 %v3885_v11, %v3698_v13 }
 0x20c   : > { %2394 = vmatmul.mubr.f32.gmra.mxu0 %v3695_v46  ;;  %v4568_v46 = vsub.s32 3, %v4564_v42  ;;  %v3972_v55 = vmul.f32 %v3885_v11, %v3720_v38 }
 0x20d   : > { %2396 = vmatprep.mubr.f32.mxu0 %v3717_v44  ;;  %v3899_v44 = vmul.f32 %v1522_v29, %v3628_v61  ;;  %v3927_v61 = vmul.f32 %v1522_v29, %v3726_v60  ;;  %4572 = vst [vmem:[#allocation15_spill] sm:$0xff] %v3937_v45  ;;  %4573 = vst [vmem:[#allocation16_spill] sm:$0xff] %v3944_v41  ;;  %v4585_v60 = vld [vmem:[#allocation5_spill] sm:$0xff] }
 0x20e   : > { %v3892_v1 = vrot.slane %v2556_v28, %v4568_v46  ;;  %4575 = vst [vmem:[#allocation20_spill] sm:$0xff] %v3951_v59  ;;  %4579 = vst [vmem:[#allocation28_spill] sm:$0xff] %v3965_v23 }
 0x20f   : > { %4581 = vst [vmem:[#allocation27_spill] sm:$0xff] %v3972_v55 }
 0x210   : > { %2397 = vmatmul.mubr.f32.gmra.mxu0 %v3711_v30 }
 0x211   : > { %2399 = vmatprep.mubr.f32.mxu0 %v3735_v48  ;;  %v3920_v48 = vmul.f32 %v1522_v29, %v3639_v21  ;;  %v3940_v21 = vmul.f32 %v1522_v29, %v3669_v24  ;;  %v3958_v24 = vmul.f32 %v3885_v11, %v3704_v5  ;;  %v3979_v5 = vmul.f32 %v3885_v11, %v3714_v53 }
 0x213   : > { %4577 = vst [vmem:[#allocation24_spill] sm:$0xff] %v3958_v24  ;;  %4583 = vst [vmem:[#allocation12_spill] sm:$0xff] %v3979_v5 }
 0x214   : > { %2400 = vmatmul.mubr.f32.gmra.mxu0 %v3723_v43  ;;  %v3902_v43 = vmul.f32 %v1522_v29, %v3855_v58 }
 0x215   : > { %2402 = vmatprep.mubr.f32.mxu0 %v3753_v35  ;;  %v3924_v35 = vmul.f32 %v3885_v11, %v3675_v3  ;;  %v3954_v3 = vmul.f32 %v1522_v29, %v3686_v7 }
 0x216   : > { %4570 = vst [vmem:[#allocation21_spill] sm:$0xff] %v3902_v43 }
 0x217   : > { %4576 = vst [vmem:[#allocation23_spill] sm:$0xff] %v3954_v3 }
 0x218   : > { %2403 = vmatmul.mubr.f32.gmra.mxu0 %v3586_v54  ;;  %v4569_v54 = vsub.s32 5, %v4564_v42  ;;  %v3982_v42 = vmul.f32 %v1522_v29, %v3714_v53 }
 0x21a   : > { %v3896_v30 = vrot.slane %v2556_v28, %v4569_v54  ;;  %v3975_v28 = vmul.f32 %v1522_v29, %v3720_v38  ;;  %4584 = vst [vmem:[#allocation7_spill] sm:$0xff] %v3982_v42 }
 0x21c   : > { %4582 = vst [vmem:[#allocation26_spill] sm:$0xff] %v3975_v28 }
 0x25d   : > { %v1218_v14 = vpop.permute.xlu0 %1217  ;;  %v1216_v62 = vpop.permute.xlu1 %1215 }
 0x25e   : > { %v1264_v8 = vrot.slane %v1218_v14, 1  ;;  %v1312_v25 = vrot.slane %v1218_v14, 7  ;;  %v1263_v7 = vrot.slane %v1216_v62, 1  ;;  %v1311_v27 = vrot.slane %v1216_v62, 7 }
 0x260   : > { %v1296_v13 = vsel %vm641_vm3, %v1264_v8, 0.0  ;;  %v1344_v20 = vsel %vm693_vm1, 0.0, %v1312_v25  ;;  %v1295_v40 = vsel %vm641_vm3, %v1263_v7, 0.0  ;;  %v1343_v46 = vsel %vm693_vm1, 0.0, %v1311_v27 }
 0x261   : > { %v1360_v54 = vsel %vm713_vm2, %v1344_v20, %v1218_v14  ;;  %v3992_v38 = vsel %vm713_vm2, %v1218_v14, %v1296_v13  ;;  %v1359_v26 = vsel %vm713_vm2, %v1343_v46, %v1216_v62  ;;  %v1375_v53 = vsel %vm713_vm2, %v1216_v62, %v1295_v40  ;;  %v1222_v8 = vpop.permute.xlu0 %1221  ;;  %v1220_v5 = vpop.permute.xlu1 %1219  ;;  %v4589_v13 = vld [vmem:[#allocation9_spill] sm:$0xff] }
 0x262   : > { %v1397_v25 = vmul.f32 %v4585_v60, %v1360_v54  ;;  %v4001_v7 = vmul.f32 %v3885_v11, %v3738_v32  ;;  %v4004_v27 = vmul.f32 %v1522_v29, %v3738_v32  ;;  %v4008_v14 = vmul.f32 %v3885_v11, %v3756_v12 }
 0x263   : > { %v1453_v20 = vmul.f32 %v4589_v13, %v3992_v38  ;;  %v1488_v62 = vmul.f32 %v3892_v1, %v1360_v54  ;;  %v1396_v40 = vmul.f32 %v4585_v60, %v1359_v26  ;;  %v1487_v46 = vmul.f32 %v3892_v1, %v1359_v26 }
 0x264   : > { %4586 = vst [vmem:[#allocation13_spill] sm:$0xff] %v4001_v7  ;;  %4587 = vst [vmem:[#allocation3_spill] sm:$0xff] %v4004_v27  ;;  %v1433_v55 = vadd.f32 %v3742_v51, %v1397_v25  ;;  %v1452_v7 = vmul.f32 %v4589_v13, %v1375_v53  ;;  %v1266_v23 = vrot.slane %v1222_v8, 1  ;;  %v1314_v32 = vrot.slane %v1222_v8, 7  ;;  %v4590_v27 = vld [vmem:[#allocation11_spill] sm:$0xff] }
 0x265   : > { %4588 = vst [vmem:[#allocation4_spill] sm:$0xff] %v4008_v14  ;;  %v1432_v29 = vadd.f32 %v3649_v37, %v1396_v40  ;;  %v1503_v12 = vadd.f32 %v1487_v46, %v4590_v27  ;;  %v1265_v14 = vrot.slane %v1220_v5, 1  ;;  %v1313_v42 = vrot.slane %v1220_v5, 7  ;;  %v1226_v24 = vpop.permute.xlu0 %1225  ;;  %v4591_v40 = vld [vmem:[#allocation6_spill] sm:$0xff] }
 0x266   : > { %v1469_v59 = vadd.f32 %v1453_v20, %v1433_v55  ;;  %v1298_v28 = vsel %vm641_vm3, %v1266_v23, 0.0  ;;  %v1346_v43 = vsel %vm693_vm1, 0.0, %v1314_v32  ;;  %v1268_v31 = vrot.slane %v1226_v24, 1 }
 0x267   : > { %v1468_v26 = vadd.f32 %v1452_v7, %v1432_v29  ;;  %v1539_v51 = vadd.f32 %v3888_v36, %v1503_v12  ;;  %v1362_v25 = vsel %vm713_vm2, %v1346_v43, %v1222_v8  ;;  %v4026_v37 = vsel %vm713_vm2, %v1222_v8, %v1298_v28  ;;  %v1224_v29 = vpop.permute.xlu1 %1223 }
 0x268   : > { %v1560_v27 = vmul.f32 %v3896_v30, %v3992_v38  ;;  %v4031_v55 = vmul.f32 %v4591_v40, %v1360_v54  ;;  %v1399_v23 = vmul.f32 %v4585_v60, %v1362_v25  ;;  %v4036_v7 = vmul.f32 %v3885_v11, %v3855_v58 }
 0x269   : > { %v1504_v36 = vadd.f32 %v1488_v62, %v1468_v26  ;;  %v1559_v20 = vmul.f32 %v3896_v30, %v1375_v53  ;;  %v1455_v43 = vmul.f32 %v4589_v13, %v4026_v37  ;;  %v1297_v28 = vsel %vm641_vm3, %v1265_v14, 0.0 }
 0x26a   : > { %4592 = vst [vmem:[#allocation2_spill] sm:$0xff] %v4036_v7  ;;  %v1435_v8 = vadd.f32 %v3746_v57, %v1399_v23  ;;  %v1490_v46 = vmul.f32 %v3892_v1, %v1362_v25  ;;  %v4046_v54 = vmul.f32 %v3896_v30, %v4026_v37  ;;  %v1345_v32 = vsel %vm693_vm1, 0.0, %v1313_v42  ;;  %v1230_v7 = vpop.permute.xlu0 %1229 }
 0x26b   : > { %v1540_v58 = vadd.f32 %v3899_v44, %v1504_v36  ;;  %v1361_v53 = vsel %vm713_vm2, %v1345_v32, %v1220_v5  ;;  %v1377_v62 = vsel %vm713_vm2, %v1220_v5, %v1297_v28  ;;  %v1300_v14 = vsel %vm641_vm3, %v1268_v31, 0.0 }
 0x26c   : > { %v4055_v57 = vadd.f32 %v1559_v20, %v1539_v51  ;;  %v1471_v12 = vadd.f32 %v1455_v43, %v1435_v8  ;;  %v4058_v26 = vmul.f32 %v4591_v40, %v1362_v25  ;;  %v1398_v23 = vmul.f32 %v4585_v60, %v1361_v53  ;;  %v4078_v8 = vld [vmem:[%s4477_s3 + $0x8] ss:$0 sm:$0xff] }
 0x26d   : > { %v1489_v42 = vmul.f32 %v3892_v1, %v1361_v53  ;;  %v1576_v44 = vadd.f32 %v1560_v27, %v1540_v58  ;;  %v1596_v36 = vmul.f32 %v4591_v40, %v1361_v53  ;;  %v1316_v32 = vrot.slane %v1226_v24, 7 }
 0x26e   : > { %v1434_v5 = vadd.f32 %v3750_v34, %v1398_v23  ;;  %v1454_v31 = vmul.f32 %v4589_v13, %v1377_v62  ;;  %v4066_v51 = vmul.f32 %v3896_v30, %v1377_v62  ;;  %v4070_v25 = vsel %vm713_vm2, %v1226_v24, %v1300_v14  ;;  %v1234_v47 = vpop.permute.xlu0 %1233 }
 0x26f   : > { %4593 = vst [vmem:[#allocation5_spill] sm:$0xff] %v4070_v25  ;;  %v4072_v20 = vadd.f32 %v1596_v36, %v1576_v44  ;;  %v1348_v43 = vsel %vm693_vm1, 0.0, %v1316_v32  ;;  %v1267_v27 = vrot.slane %v1224_v29, 1  ;;  %v1315_v28 = vrot.slane %v1224_v29, 7  ;;  %v1228_v32 = vpop.permute.xlu1 %1227 }
 0x270   : > { %v1470_v34 = vadd.f32 %v1454_v31, %v1434_v5  ;;  %v1364_v58 = vsel %vm713_vm2, %v1348_v43, %v1226_v24  ;;  %v1270_v53 = vrot.slane %v1230_v7, 1  ;;  %v1318_v23 = vrot.slane %v1230_v7, 7 }
 0x271   : > { %v4082_v11 = vadd.f32 %v1489_v42, %v1469_v59  ;;  %v4085_v14 = vmul.f32 %v4078_v8, %v1377_v62  ;;  %v1401_v44 = vmul.f32 %v4585_v60, %v1364_v58  ;;  %v1299_v36 = vsel %vm641_vm3, %v1267_v27, 0.0 }
 0x272   : > { %v1457_v41 = vmul.f32 %v4589_v13, %v4070_v25  ;;  %v4093_v5 = vmul.f32 %v3896_v30, %v4070_v25  ;;  %v1347_v24 = vsel %vm693_vm1, 0.0, %v1315_v28  ;;  %v1302_v59 = vsel %vm641_vm3, %v1270_v53, 0.0 }
 0x273   : > { %v1437_v42 = vadd.f32 %v3760_v39, %v1401_v44  ;;  %v1492_v62 = vmul.f32 %v3892_v1, %v1364_v58  ;;  %v1363_v31 = vsel %vm713_vm2, %v1347_v24, %v1224_v29  ;;  %v4103_v43 = vsel %vm713_vm2, %v1224_v29, %v1299_v36 }
 0x274   : > { %4594 = vst [vmem:[#allocation9_spill] sm:$0xff] %v4093_v5  ;;  %v4106_v27 = vmul.f32 %v4591_v40, %v1364_v58  ;;  %v1400_v33 = vmul.f32 %v4585_v60, %v1363_v31  ;;  %v1491_v28 = vmul.f32 %v3892_v1, %v1363_v31  ;;  %v1350_v53 = vsel %vm693_vm1, 0.0, %v1318_v23 }
 0x275   : > { %v1473_v3 = vadd.f32 %v1457_v41, %v1437_v42  ;;  %v1366_v39 = vsel %vm713_vm2, %v1350_v53, %v1230_v7  ;;  %v4115_v44 = vsel %vm713_vm2, %v1230_v7, %v1302_v59  ;;  %v1269_v24 = vrot.slane %v1228_v32, 1 }
 0x276   : > { %4595 = vst [vmem:[#allocation11_spill] sm:$0xff] %v4115_v44  ;;  %v4117_v29 = vadd.f32 %v1490_v46, %v1470_v34  ;;  %v1436_v58 = vadd.f32 %v3764_v2, %v1400_v33  ;;  %v1456_v36 = vmul.f32 %v4589_v13, %v4103_v43  ;;  %v1403_v22 = vmul.f32 %v4585_v60, %v1366_v39  ;;  %v1232_v34 = vpop.permute.xlu1 %1231 }
 0x277   : > { %v4123_v23 = vadd.f32 %v1491_v28, %v1471_v12  ;;  %v4127_v41 = vmul.f32 %v3896_v30, %v4103_v43  ;;  %v4130_v7 = vmul.f32 %v4591_v40, %v1363_v31  ;;  %v1301_v46 = vsel %vm641_vm3, %v1269_v24, 0.0 }
 0x278   : > { %v1472_v59 = vadd.f32 %v1456_v36, %v1436_v58  ;;  %v1439_v2 = vadd.f32 %v3774_v16, %v1403_v22  ;;  %v1459_v33 = vmul.f32 %v4589_v13, %v4115_v44  ;;  %v1317_v42 = vrot.slane %v1228_v32, 7 }
 0x279   : > { %v1494_v12 = vmul.f32 %v3892_v1, %v1366_v39  ;;  %v4139_v28 = vsel %vm713_vm2, %v1228_v32, %v1301_v46  ;;  %v1272_v53 = vrot.slane %v1234_v47, 1  ;;  %v1320_v5 = vrot.slane %v1234_v47, 7 }
 0x27a   : > { %4596 = vst [vmem:[#allocation6_spill] sm:$0xff] %v4139_v28  ;;  %v1475_v31 = vadd.f32 %v1459_v33, %v1439_v2  ;;  %v4143_v24 = vmul.f32 %v3896_v30, %v4115_v44  ;;  %v1349_v58 = vsel %vm693_vm1, 0.0, %v1317_v42  ;;  %v1271_v16 = vrot.slane %v1232_v34, 1 }
 0x27b   : > { %v1365_v22 = vsel %vm713_vm2, %v1349_v58, %v1228_v32  ;;  %v1304_v36 = vsel %vm641_vm3, %v1272_v53, 0.0  ;;  %v1352_v25 = vsel %vm693_vm1, 0.0, %v1320_v5  ;;  %v1319_v45 = vrot.slane %v1232_v34, 7 }
 0x27c   : > { %4597 = vst [vmem:[#allocation30_spill] sm:$0xff] %v4143_v24  ;;  %v4151_v46 = vmul.f32 %v4591_v40, %v1366_v39  ;;  %v1402_v2 = vmul.f32 %v4585_v60, %v1365_v22  ;;  %v1458_v33 = vmul.f32 %v4589_v13, %v4139_v28  ;;  %v1368_v42 = vsel %vm713_vm2, %v1352_v25, %v1234_v47  ;;  %v1238_v24 = vpop.permute.xlu0 %1237 }
 0x27d   : > { %v1493_v44 = vmul.f32 %v3892_v1, %v1365_v22  ;;  %v4161_v32 = vmul.f32 %v3896_v30, %v4139_v28  ;;  %v4165_v5 = vsel %vm713_vm2, %v1234_v47, %v1304_v36  ;;  %v1405_v39 = vmul.f32 %v4585_v60, %v1368_v42 }
 0x27e   : > { %4598 = vst [vmem:[#allocation31_spill] sm:$0xff] %v4151_v46  ;;  %4600 = vst [vmem:[#allocation33_spill] sm:$0xff] %v4165_v5  ;;  %v4168_v53 = vadd.f32 %v1492_v62, %v1472_v59  ;;  %v1438_v58 = vadd.f32 %v3778_v10, %v1402_v2  ;;  %v4172_v46 = vmul.f32 %v4591_v40, %v1365_v22  ;;  %v1351_v28 = vsel %vm693_vm1, 0.0, %v1319_v45  ;;  %v1236_v2 = vpop.permute.xlu1 %1235 }
 0x27f   : > { %4599 = vst [vmem:[#allocation32_spill] sm:$0xff] %v4161_v32  ;;  %v1461_v25 = vmul.f32 %v4589_v13, %v4165_v5  ;;  %v1441_v56 = vadd.f32 %v3782_v18, %v1405_v39  ;;  %v1303_v32 = vsel %vm641_vm3, %v1271_v16, 0.0  ;;  %v1611_v47 = vadd.f32 %v4031_v55, %v4055_v57 }
 0x280   : > { %v1474_v36 = vadd.f32 %v1458_v33, %v1438_v58  ;;  %v1496_v62 = vmul.f32 %v3892_v1, %v1368_v42  ;;  %v1367_v10 = vsel %vm713_vm2, %v1351_v28, %v1232_v34  ;;  %v4186_v59 = vsel %vm713_vm2, %v1232_v34, %v1303_v32 }
 0x281   : > { %v4188_v22 = vadd.f32 %v1493_v44, %v1473_v3  ;;  %v1477_v18 = vadd.f32 %v1461_v25, %v1441_v56  ;;  %v4191_v16 = vmul.f32 %v4591_v40, %v1368_v42  ;;  %v1404_v45 = vmul.f32 %v4585_v60, %v1367_v10  ;;  %v1242_v44 = vpop.permute.xlu0 %1241 }
 0x282   : > { %v4196_v55 = vmul.f32 %v3896_v30, %v4165_v5  ;;  %v1460_v57 = vmul.f32 %v4589_v13, %v4186_v59  ;;  %v1647_v28 = vadd.f32 %v3906_v6, %v1611_v47  ;;  %v1667_v3 = vmul.f32 %v4078_v8, %v3992_v38 }
 0x283   : > { %v1440_v56 = vadd.f32 %v3790_v9, %v1404_v45  ;;  %v1495_v34 = vmul.f32 %v3892_v1, %v1367_v10  ;;  %v1274_v33 = vrot.slane %v1238_v24, 1  ;;  %v1322_v42 = vrot.slane %v1238_v24, 7 }
 0x284   : > { %4601 = vst [vmem:[#allocation34_spill] sm:$0xff] %v4196_v55  ;;  %v1683_v32 = vadd.f32 %v1667_v3, %v1647_v28  ;;  %v1273_v39 = vrot.slane %v1236_v2, 1  ;;  %v1321_v58 = vrot.slane %v1236_v2, 7  ;;  %v1648_v25 = vadd.f32 %v3910_v63, %v4072_v20 }
 0x285   : > { %v1476_v5 = vadd.f32 %v1460_v57, %v1440_v56  ;;  %v1306_v55 = vsel %vm641_vm3, %v1274_v33, 0.0  ;;  %v1354_v6 = vsel %vm693_vm1, 0.0, %v1322_v42  ;;  %v1276_v47 = vrot.slane %v1242_v44, 1 }
 0x286   : > { %2437 = vmatprep.mubr.f32.mxu1 %v1683_v32  ;;  %v1370_v9 = vsel %vm713_vm2, %v1354_v6, %v1238_v24  ;;  %v4213_v38 = vsel %vm713_vm2, %v1238_v24, %v1306_v55  ;;  %v1305_v45 = vsel %vm641_vm3, %v1273_v39, 0.0  ;;  %v1353_v28 = vsel %vm693_vm1, 0.0, %v1321_v58 }
 0x287   : > { %v4217_v3 = vadd.f32 %v1494_v12, %v1474_v36  ;;  %v4221_v63 = vmul.f32 %v3896_v30, %v4186_v59  ;;  %v4224_v20 = vmul.f32 %v4591_v40, %v1367_v10  ;;  %v1407_v57 = vmul.f32 %v4585_v60, %v1370_v9 }
 0x288   : > { %v4227_v56 = vadd.f32 %v1495_v34, %v1475_v31  ;;  %v4229_v33 = vadd.f32 %v1496_v62, %v1476_v5  ;;  %v1369_v24 = vsel %vm713_vm2, %v1353_v28, %v1236_v2  ;;  %v4235_v12 = vsel %vm713_vm2, %v1236_v2, %v1305_v45  ;;  %v1240_v31 = vpop.permute.xlu1 %1239 }
 0x289   : > { %v1443_v36 = vadd.f32 %v3794_v0, %v1407_v57  ;;  %v1463_v55 = vmul.f32 %v4589_v13, %v4213_v38  ;;  %v1498_v10 = vmul.f32 %v3892_v1, %v1370_v9  ;;  %v1406_v42 = vmul.f32 %v4585_v60, %v1369_v24 }
 0x28a   : > { %v4244_v5 = vmul.f32 %v3896_v30, %v4213_v38  ;;  %v1462_v62 = vmul.f32 %v4589_v13, %v4235_v12  ;;  %v1684_v2 = vadd.f32 %v4085_v14, %v1648_v25  ;;  %v1308_v34 = vsel %vm641_vm3, %v1276_v47, 0.0 }
 0x28b   : > { %v1479_v0 = vadd.f32 %v1463_v55, %v1443_v36  ;;  %v1442_v32 = vadd.f32 %v3798_v49, %v1406_v42  ;;  %v1497_v39 = vmul.f32 %v3892_v1, %v1369_v24  ;;  %v1324_v58 = vrot.slane %v1242_v44, 7 }
 0x28c   : > { %2438 = vmatmul.mubr.f32.vlgmr.msra.gmra.mxu1 %v1684_v2  ;;  %v4254_v6 = vsel %vm713_vm2, %v1242_v44, %v1308_v34  ;;  %v1275_v45 = vrot.slane %v1240_v31, 1  ;;  %v1323_v28 = vrot.slane %v1240_v31, 7  ;;  %v1541_v57 = vadd.f32 %v3913_v52, %v4082_v11 }
 0x28d   : > { %4602 = vst [vmem:[#allocation35_spill] sm:$0xff] %v4254_v6  ;;  %v4259_v14 = vmul.f32 %v4591_v40, %v1370_v9  ;;  %v1478_v25 = vadd.f32 %v1462_v62, %v1442_v32  ;;  %v4263_v49 = vmul.f32 %v3896_v30, %v4235_v12  ;;  %v1356_v47 = vsel %vm693_vm1, 0.0, %v1324_v58 }
 0x28e   : > { %v1372_v36 = vsel %vm713_vm2, %v1356_v47, %v1242_v44  ;;  %v1307_v55 = vsel %vm641_vm3, %v1275_v45, 0.0  ;;  %v1355_v42 = vsel %vm693_vm1, 0.0, %v1323_v28  ;;  %v1577_v2 = vadd.f32 %v4066_v51, %v1541_v57  ;;  %v1244_v47 = vpop.permute.xlu1 %1243 }
 0x28f   : > { %v4271_v11 = vadd.f32 %v1497_v39, %v1477_v18  ;;  %v4274_v52 = vmul.f32 %v4591_v40, %v1369_v24  ;;  %v1409_v9 = vmul.f32 %v4585_v60, %v1372_v36  ;;  %v1465_v62 = vmul.f32 %v4589_v13, %v4254_v6  ;;  %v1246_v18 = vpop.permute.xlu0 %1245 }
 0x290   : > { %v1572_v34 = vmul.f32 %v3896_v30, %v4254_v6  ;;  %v1371_v44 = vsel %vm713_vm2, %v1355_v42, %v1240_v31  ;;  %v4285_v32 = vsel %vm713_vm2, %v1240_v31, %v1307_v55  ;;  %v1613_v51 = vadd.f32 %v4058_v26, %v1577_v2 }
 0x291   : > { %v4288_v24 = vadd.f32 %v1498_v10, %v1478_v25  ;;  %v1445_v39 = vadd.f32 %v3802_v15, %v1409_v9  ;;  %v1500_v58 = vmul.f32 %v3892_v1, %v1372_v36  ;;  %v1408_v45 = vmul.f32 %v4585_v60, %v1371_v44 }
 0x292   : > { %v4294_v28 = vmul.f32 %v4591_v40, %v1372_v36  ;;  %v1649_v57 = vadd.f32 %v3917_v50, %v1613_v51  ;;  %v1669_v31 = vmul.f32 %v4078_v8, %v4026_v37  ;;  %v1542_v26 = vadd.f32 %v3920_v48, %v4117_v29 }
 0x293   : > { %v1444_v10 = vadd.f32 %v3806_v4, %v1408_v45  ;;  %v1464_v15 = vmul.f32 %v4589_v13, %v4285_v32  ;;  %v1499_v25 = vmul.f32 %v3892_v1, %v1371_v44  ;;  %v1278_v55 = vrot.slane %v1246_v18, 1 }
 0x294   : > { %v1685_v42 = vadd.f32 %v1669_v31, %v1649_v57  ;;  %v1578_v36 = vadd.f32 %v4046_v54, %v1542_v26  ;;  %v1326_v2 = vrot.slane %v1246_v18, 7  ;;  %v1481_v50 = vadd.f32 %v1465_v62, %v1445_v39 }
 0x295   : > { %v1480_v9 = vadd.f32 %v1464_v15, %v1444_v10  ;;  %v1310_v37 = vsel %vm641_vm3, %v1278_v55, 0.0  ;;  %v1277_v51 = vrot.slane %v1244_v47, 1  ;;  %v1325_v6 = vrot.slane %v1244_v47, 7 }
 0x296   : > { %v4309_v48 = vmul.f32 %v3896_v30, %v4285_v32  ;;  %2440 = vmatprep.mubr.f32.mxu1 %v1685_v42  ;;  %v1614_v4 = vadd.f32 %v4130_v7, %v1578_v36  ;;  %v1358_v29 = vsel %vm693_vm1, 0.0, %v1326_v2  ;;  %v1543_v45 = vadd.f32 %v3933_v19, %v4123_v23  ;;  %v4604_v2 = vld [vmem:[#allocation15_spill] sm:$0xff] }
 0x297   : > { %v1516_v54 = vadd.f32 %v1500_v58, %v1480_v9  ;;  %v4316_v62 = vmul.f32 %v4591_v40, %v1371_v44  ;;  %v1374_v39 = vsel %vm713_vm2, %v1358_v29, %v1246_v18  ;;  %v4322_v57 = vsel %vm713_vm2, %v1246_v18, %v1310_v37  ;;  %v4605_v37 = vld [vmem:[#allocation5_spill] sm:$0xff] }
 0x298   : > { %v4324_v31 = vadd.f32 %v1499_v25, %v1479_v0  ;;  %v1650_v7 = vadd.f32 %v3924_v35, %v1614_v4  ;;  %v1670_v26 = vmul.f32 %v4078_v8, %v4103_v43  ;;  %v1309_v19 = vsel %vm641_vm3, %v1277_v51, 0.0  ;;  %v4606_v51 = vld [vmem:[#allocation9_spill] sm:$0xff] }
 0x299   : > { %v1552_v23 = vadd.f32 %v3927_v61, %v1516_v54  ;;  %v1357_v44 = vsel %vm693_vm1, 0.0, %v1325_v6  ;;  %v4334_v58 = vsel %vm713_vm2, %v1244_v47, %v1309_v19  ;;  %v1579_v18 = vadd.f32 %v4127_v41, %v1543_v45  ;;  %v4608_v45 = vld [vmem:[#allocation22_spill] sm:$0xff]  ;;  %v4610_v54 = vld [vmem:[#allocation23_spill] sm:$0xff] }
 0x29a   : > { %v1686_v10 = vadd.f32 %v1670_v26, %v1650_v7  ;;  %v1502_v0 = vmul.f32 %v3892_v1, %v1374_v39  ;;  %v4340_v35 = vmul.f32 %v3896_v30, %v4322_v57  ;;  %v1373_v43 = vsel %vm713_vm2, %v1357_v44, %v1244_v47  ;;  %v4611_v26 = vld [vmem:[#allocation32_spill] sm:$0xff] }
 0x29b   : > { %v1588_v15 = vadd.f32 %v1572_v34, %v1552_v23  ;;  %v1410_v61 = vmul.f32 %v4585_v60, %v1373_v43  ;;  %v1501_v6 = vmul.f32 %v3892_v1, %v1373_v43  ;;  %v1608_v25 = vmul.f32 %v4591_v40, %v1373_v43  ;;  %v4612_v23 = vld [vmem:[#allocation25_spill] sm:$0xff]  ;;  %v4614_v43 = vld [vmem:[#allocation30_spill] sm:$0xff] }
 0x29c   : > { %2441 = vmatmul.mubr.f32.gmra.mxu1 %v1686_v10  ;;  %v1609_v41 = vmul.f32 %v4591_v40, %v1374_v39  ;;  %v1466_v55 = vmul.f32 %v4589_v13, %v4334_v58  ;;  %v1615_v42 = vadd.f32 %v4106_v27, %v1579_v18  ;;  %v1544_v36 = vadd.f32 %v3940_v21, %v4168_v53  ;;  %v4607_v13 = vld [vmem:[#allocation19_spill] sm:$0xff]  ;;  %v4609_v53 = vld [vmem:[#allocation6_spill] sm:$0xff] }
 0x29d   : > { %v1446_v47 = vadd.f32 %v4603_v17, %v1410_v61  ;;  %v1517_v34 = vadd.f32 %v1501_v6, %v1481_v50  ;;  %v1573_v60 = vmul.f32 %v3896_v30, %v4334_v58  ;;  %v1624_v1 = vadd.f32 %v1608_v25, %v1588_v15  ;;  %v4613_v10 = vld [vmem:[#allocation11_spill] sm:$0xff]  ;;  %v4615_v6 = vld [vmem:[#allocation16_spill] sm:$0xff] }
 0x29e   : > { %v1651_v9 = vadd.f32 %v4604_v2, %v1615_v42  ;;  %v1671_v40 = vmul.f32 %v4078_v8, %v4605_v37  ;;  %v1580_v4 = vadd.f32 %v4606_v51, %v1544_v36  ;;  %v1545_v27 = vadd.f32 %v4607_v13, %v4188_v22  ;;  %v4616_v25 = vld [vmem:[#allocation31_spill] sm:$0xff]  ;;  %v4617_v42 = vld [vmem:[#allocation29_spill] sm:$0xff]  ;;  %v4621_v51 = vld [vmem:[#allocation34_spill] sm:$0xff] }
 0x29f   : > { %v1482_v29 = vadd.f32 %v1466_v55, %v1446_v47  ;;  %v1553_v21 = vadd.f32 %v4608_v45, %v1517_v34  ;;  %v1672_v50 = vmul.f32 %v4078_v8, %v4609_v53  ;;  %v1546_v30 = vadd.f32 %v4610_v54, %v4217_v3  ;;  %v4619_v34 = vld [vmem:[#allocation26_spill] sm:$0xff]  ;;  %v4622_v13 = vld [vmem:[#allocation24_spill] sm:$0xff] }
 0x2a0   : > { %v1687_v39 = vadd.f32 %v1671_v40, %v1651_v9  ;;  %v1616_v7 = vadd.f32 %v4172_v46, %v1580_v4  ;;  %v1581_v19 = vadd.f32 %v4611_v26, %v1545_v27  ;;  %v1547_v44 = vadd.f32 %v4612_v23, %v4227_v56  ;;  %v4618_v56 = vld [vmem:[#allocation21_spill] sm:$0xff]  ;;  %v4628_v23 = vld [vmem:[#allocation4_spill] sm:$0xff] }
 0x2a1   : > { %v1518_v18 = vadd.f32 %v1502_v0, %v1482_v29  ;;  %v1673_v22 = vmul.f32 %v4078_v8, %v4613_v10  ;;  %v1582_v15 = vadd.f32 %v4614_v43, %v1546_v30  ;;  %v1674_v61 = vmul.f32 %v4078_v8, %v4186_v59  ;;  %v4620_v59 = vld [vmem:[#allocation20_spill] sm:$0xff]  ;;  %v4623_v27 = vld [vmem:[#allocation33_spill] sm:$0xff] }
 0x2a2   : > { %2443 = vmatprep.mubr.f32.mxu1 %v1687_v39  ;;  %v1652_v3 = vadd.f32 %v4615_v6, %v1616_v7  ;;  %v1617_v55 = vadd.f32 %v4616_v25, %v1581_v19  ;;  %v1583_v46 = vadd.f32 %v4221_v63, %v1547_v44  ;;  %v1548_v36 = vadd.f32 %v4617_v42, %v4229_v33  ;;  %v4626_v39 = vld [vmem:[#allocation3_spill] sm:$0xff]  ;;  %v4629_v44 = vld [vmem:[#allocation12_spill] sm:$0xff]  ;;  %v4632_v6 = vld [vmem:[#allocation13_spill] sm:$0xff] }
 0x2a3   : > { %v1554_v0 = vadd.f32 %v4618_v56, %v1518_v18  ;;  %v1589_v17 = vadd.f32 %v1573_v60, %v1553_v21  ;;  %v1618_v47 = vadd.f32 %v4224_v20, %v1582_v15  ;;  %v1549_v2 = vadd.f32 %v4619_v34, %v4271_v11  ;;  %v4624_v60 = vld [vmem:[#allocation7_spill] sm:$0xff]  ;;  %v4625_v11 = vld [vmem:[#allocation28_spill] sm:$0xff]  ;;  %v4636_v34 = vld [vmem:[#allocation10_spill] sm:$0xff] }
 0x2a4   : > { %v1688_v9 = vadd.f32 %v1672_v50, %v1652_v3  ;;  %v1653_v37 = vadd.f32 %v4620_v59, %v1617_v55  ;;  %v1619_v40 = vadd.f32 %v4191_v16, %v1583_v46  ;;  %v1584_v4 = vadd.f32 %v4621_v51, %v1548_v36  ;;  %v4633_v3 = vld [vmem:[#allocation2_spill] sm:$0xff]  ;;  %v4635_v46 = vld [vmem:[#allocation35_spill] sm:$0xff] }
 0x2a5   : > { %v1654_v63 = vadd.f32 %v4622_v13, %v1618_v47  ;;  %v1675_v33 = vmul.f32 %v4078_v8, %v4623_v27  ;;  %v1585_v29 = vadd.f32 %v4263_v49, %v1549_v2  ;;  %v1550_v20 = vadd.f32 %v4624_v60, %v4288_v24  ;;  %v4627_v24 = vld [vmem:[#allocation27_spill] sm:$0xff] }
 0x2a6   : > { %2444 = vmatmul.mubr.f32.gmra.mxu1 %v1688_v9  ;;  %v1689_v45 = vadd.f32 %v1673_v22, %v1653_v37  ;;  %v1655_v21 = vadd.f32 %v4625_v11, %v1619_v40  ;;  %v1620_v53 = vadd.f32 %v4274_v52, %v1584_v4  ;;  %v1676_v16 = vmul.f32 %v4078_v8, %v4235_v12  ;;  %v4630_v22 = vld [vmem:[#allocation17_spill] sm:$0xff] }
 0x2a7   : > { %v1690_v50 = vadd.f32 %v1674_v61, %v1654_v63  ;;  %v1621_v54 = vadd.f32 %v4259_v14, %v1585_v29  ;;  %v1586_v30 = vadd.f32 %v4244_v5, %v1550_v20  ;;  %v1551_v49 = vadd.f32 %v4626_v39, %v4324_v31  ;;  %v4631_v31 = vld [vmem:[#allocation18_spill] sm:$0xff] }
 0x2a8   : > { %2446 = vmatprep.mubr.f32.mxu1 %v1689_v45  ;;  %v1691_v7 = vadd.f32 %v1675_v33, %v1655_v21  ;;  %v1656_v26 = vadd.f32 %v4627_v24, %v1620_v53  ;;  %v1677_v19 = vmul.f32 %v4078_v8, %v4213_v38  ;;  %v1660_v52 = vadd.f32 %v4628_v23, %v1624_v1 }
 0x2a9   : > { %v1657_v18 = vadd.f32 %v4629_v44, %v1621_v54  ;;  %v1622_v12 = vadd.f32 %v4316_v62, %v1586_v30  ;;  %v1587_v14 = vadd.f32 %v4309_v48, %v1551_v49  ;;  %v1625_v10 = vadd.f32 %v1609_v41, %v1589_v17  ;;  %v4634_v48 = vld [vmem:[#allocation8_spill] sm:$0xff] }
 0x2aa   : > { %2447 = vmatmul.mubr.f32.gmra.mxu1 %v1690_v50  ;;  %v1692_v5 = vadd.f32 %v1676_v16, %v1656_v26  ;;  %v1643_v43 = vmul.f32 %v4631_v31, %v4630_v22  ;;  %v1590_v15 = vadd.f32 %v4340_v35, %v1554_v0  ;;  %v1678_v62 = vmul.f32 %v4078_v8, %v4285_v32 }
 0x2ab   : > { %2449 = vmatprep.mubr.f32.mxu1 %v1691_v7  ;;  %v1693_v61 = vadd.f32 %v1677_v19, %v1657_v18  ;;  %v1658_v38 = vadd.f32 %v4632_v6, %v1622_v12  ;;  %v1623_v1 = vadd.f32 %v4294_v28, %v1587_v14  ;;  %v1661_v25 = vadd.f32 %v4633_v3, %v1625_v10 }
 0x2ac   : > { %v1626_v41 = vadd.f32 %v4634_v48, %v1590_v15  ;;  %v1679_v42 = vmul.f32 %v4078_v8, %v4635_v46  ;;  %v1646_v35 = vmul.f32 0.0, %v4631_v31  ;;  %v1680_v28 = vmul.f32 %v4078_v8, %v4334_v58 }
 0x2ad   : > { %v1659_v55 = vadd.f32 %v1643_v43, %v1623_v1  ;;  %v1694_v36 = vadd.f32 %v1678_v62, %v1658_v38  ;;  %v1681_v0 = vmul.f32 %v4078_v8, %v4322_v57  ;;  %v1682_v2 = vmul.f32 %v4078_v8, %v4636_v34  ;;  %v4430_v57 = vld [vmem:[%s4482_s8] ss:$0 sm:$0xff] }
 0x2ae   : > { %2450 = vmatmul.mubr.f32.gmra.mxu1 %v1692_v5  ;;  %v1696_v32 = vadd.f32 %v1680_v28, %v1660_v52  ;;  %v1662_v17 = vadd.f32 %v1646_v35, %v1626_v41 }
 0x2af   : > { %2452 = vmatprep.mubr.f32.mxu1 %v1693_v61  ;;  %v1695_v56 = vadd.f32 %v1679_v42, %v1659_v55  ;;  %v1697_v47 = vadd.f32 %v1681_v0, %v1661_v25 }
 0x2b0   : > { %v1698_v9 = vadd.f32 %v1682_v2, %v1662_v17 }
 0x2b2   : > { %2453 = vmatmul.mubr.f32.gmra.mxu1 %v1694_v36 }
 0x2b3   : > { %2455 = vmatprep.mubr.f32.mxu1 %v1695_v56 }
 0x2b6   : > { %2456 = vmatmul.mubr.f32.gmra.mxu1 %v1696_v32 }
 0x2b7   : > { %2458 = vmatprep.mubr.f32.mxu1 %v1697_v47 }
 0x2ba   : > { %2459 = vmatmul.mubr.f32.gmra.mxu1 %v1698_v9 }
 0x2bc   : > { %v2383_v59 = vpop.f32.mrf.mxu0 }
 0x2be   : > { %v1798_v37 = vpop.f32.mrf.mxu0 }
 0x2c0   : > { %v2386_v40 = vpop.f32.mrf.mxu0 }
 0x2c2   : > { %v1808_v51 = vpop.f32.mrf.mxu0 }
 0x2c4   : > { %v2389_v27 = vpop.f32.mrf.mxu0 }
 0x2c6   : > { %v1818_v45 = vpop.f32.mrf.mxu0 }
 0x2c8   : > { %v2392_v21 = vpop.f32.mrf.mxu0 }
 0x2ca   : > { %v1828_v16 = vpop.f32.mrf.mxu0 }
 0x2cc   : > { %v2395_v49 = vpop.f32.mrf.mxu0 }
 0x2ce   : > { %v1838_v23 = vpop.f32.mrf.mxu0 }
 0x2d0   : > { %v2398_v14 = vpop.f32.mrf.mxu0 }
 0x2d2   : > { %v1848_v6 = vpop.f32.mrf.mxu0 }
 0x2d4   : > { %v2401_v36 = vpop.f32.mrf.mxu0 }
 0x34c   : > { %v2439_v58 = vpop.f32.mrf.mxu1 }
 0x34d   : > { %v1949_v4 = vadd.f32 %v2439_v58, %v2383_v59  ;;  %v1858_v59 = vpop.f32.mrf.mxu0 }
 0x34e   : > { %v1943_v13 = vpop.f32.mrf.mxu1 }
 0x34f   : > { %v2029_v63 = vadd.f32 %v4430_v57, %v1949_v4  ;;  %v1944_v8 = vadd.f32 %v1943_v13, %v1798_v37 }
 0x351   : > { %v2045_v33 = vmax.f32 %v2029_v63, 0.0  ;;  %v2028_v29 = vadd.f32 %v4430_v57, %v1944_v8 }
 0x353   : > { %v2061_v60 = vmin.f32 %v2045_v33, 6.0  ;;  %v2044_v20 = vmax.f32 %v2028_v29, 0.0  ;;  %v2404_v33 = vpop.f32.mrf.mxu0 }
 0x355   : > { %2077 = vst [vmem:[%s4439_s25 + $0x8] sm:$0xff] %v2061_v60  ;;  %v2060_v11 = vmin.f32 %v2044_v20, 6.0 }
 0x357   : > { %2076 = vst [vmem:[%s4439_s25] sm:$0xff] %v2060_v11 }
 0x35c   : > { %v2442_v53 = vpop.f32.mrf.mxu1 }
 0x35d   : > { %v1959_v50 = vadd.f32 %v2442_v53, %v2386_v40 }
 0x35e   : > { %v1953_v54 = vpop.f32.mrf.mxu1 }
 0x35f   : > { %v2031_v30 = vadd.f32 %v4430_v57, %v1959_v50  ;;  %v1954_v39 = vadd.f32 %v1953_v54, %v1808_v51 }
 0x361   : > { %v2047_v7 = vmax.f32 %v2031_v30, 0.0  ;;  %v2030_v24 = vadd.f32 %v4430_v57, %v1954_v39  ;;  %v1868_v30 = vpop.f32.mrf.mxu0 }
 0x363   : > { %v2063_v26 = vmin.f32 %v2047_v7, 6.0  ;;  %v2046_v19 = vmax.f32 %v2030_v24, 0.0 }
 0x365   : > { %2079 = vst [vmem:[%s4439_s25 + $0x18] sm:$0xff] %v2063_v26  ;;  %v2062_v52 = vmin.f32 %v2046_v19, 6.0 }
 0x366   : > { %v2445_v44 = vpop.f32.mrf.mxu1 }
 0x367   : > { %2078 = vst [vmem:[%s4439_s25 + $0x10] sm:$0xff] %v2062_v52  ;;  %v1969_v18 = vadd.f32 %v2445_v44, %v2389_v27 }
 0x368   : > { %v1963_v12 = vpop.f32.mrf.mxu1 }
 0x369   : > { %v2033_v10 = vadd.f32 %v4430_v57, %v1969_v18  ;;  %v1964_v5 = vadd.f32 %v1963_v12, %v1818_v45 }
 0x36a   : > { %v2448_v22 = vpop.f32.mrf.mxu1 }
 0x36b   : > { %v2049_v31 = vmax.f32 %v2033_v10, 0.0  ;;  %v2032_v43 = vadd.f32 %v4430_v57, %v1964_v5  ;;  %v1979_v15 = vadd.f32 %v2448_v22, %v2392_v21 }
 0x36c   : > { %v1973_v61 = vpop.f32.mrf.mxu1 }
 0x36d   : > { %v2065_v38 = vmin.f32 %v2049_v31, 6.0  ;;  %v2048_v1 = vmax.f32 %v2032_v43, 0.0  ;;  %v2035_v3 = vadd.f32 %v4430_v57, %v1979_v15  ;;  %v1974_v25 = vadd.f32 %v1973_v61, %v1828_v16 }
 0x36e   : > { %v2451_v62 = vpop.f32.mrf.mxu1 }
 0x36f   : > { %2081 = vst [vmem:[%s4439_s25 + $0x28] sm:$0xff] %v2065_v38  ;;  %v2064_v48 = vmin.f32 %v2048_v1, 6.0  ;;  %v2051_v41 = vmax.f32 %v2035_v3, 0.0  ;;  %v2034_v55 = vadd.f32 %v4430_v57, %v1974_v25  ;;  %v1989_v46 = vadd.f32 %v2451_v62, %v2395_v49 }
 0x370   : > { %v1983_v42 = vpop.f32.mrf.mxu1 }
 0x371   : > { %2080 = vst [vmem:[%s4439_s25 + $0x20] sm:$0xff] %v2064_v48  ;;  %v2067_v35 = vmin.f32 %v2051_v41, 6.0  ;;  %v2050_v56 = vmax.f32 %v2034_v55, 0.0  ;;  %v2037_v28 = vadd.f32 %v4430_v57, %v1989_v46  ;;  %v1984_v0 = vadd.f32 %v1983_v42, %v1838_v23 }
 0x372   : > { %v2454_v32 = vpop.f32.mrf.mxu1 }
 0x373   : > { %2083 = vst [vmem:[%s4439_s25 + $0x38] sm:$0xff] %v2067_v35  ;;  %v2066_v17 = vmin.f32 %v2050_v56, 6.0  ;;  %v2053_v47 = vmax.f32 %v2037_v28, 0.0  ;;  %v2036_v34 = vadd.f32 %v4430_v57, %v1984_v0  ;;  %v1999_v2 = vadd.f32 %v2454_v32, %v2398_v14 }
 0x374   : > { %v1993_v9 = vpop.f32.mrf.mxu1 }
 0x375   : > { %2082 = vst [vmem:[%s4439_s25 + $0x30] sm:$0xff] %v2066_v17  ;;  %v2069_v37 = vmin.f32 %v2053_v47, 6.0  ;;  %v2052_v40 = vmax.f32 %v2036_v34, 0.0  ;;  %v2039_v58 = vadd.f32 %v4430_v57, %v1999_v2  ;;  %v1994_v51 = vadd.f32 %v1993_v9, %v1848_v6 }
 0x376   : > { %v2457_v4 = vpop.f32.mrf.mxu1 }
 0x377   : > { %2085 = vst [vmem:[%s4439_s25 + $0x48] sm:$0xff] %v2069_v37  ;;  %v2068_v13 = vmin.f32 %v2052_v40, 6.0  ;;  %v2055_v63 = vmax.f32 %v2039_v58, 0.0  ;;  %v2038_v8 = vadd.f32 %v4430_v57, %v1994_v51  ;;  %v2009_v27 = vadd.f32 %v2457_v4, %v2401_v36 }
 0x378   : > { %v2003_v29 = vpop.f32.mrf.mxu1 }
 0x379   : > { %2084 = vst [vmem:[%s4439_s25 + $0x40] sm:$0xff] %v2068_v13  ;;  %v2071_v60 = vmin.f32 %v2055_v63, 6.0  ;;  %v2054_v20 = vmax.f32 %v2038_v8, 0.0  ;;  %v2041_v45 = vadd.f32 %v4430_v57, %v2009_v27  ;;  %v2004_v11 = vadd.f32 %v2003_v29, %v1858_v59 }
 0x37a   : > { %v2460_v21 = vpop.f32.mrf.mxu1 }
 0x37b   : > { %2087 = vst [vmem:[%s4439_s25 + $0x58] sm:$0xff] %v2071_v60  ;;  %v2070_v53 = vmin.f32 %v2054_v20, 6.0  ;;  %v2057_v16 = vmax.f32 %v2041_v45, 0.0  ;;  %v2040_v50 = vadd.f32 %v4430_v57, %v2004_v11  ;;  %v2019_v54 = vadd.f32 %v2460_v21, %v2404_v33 }
 0x37c   : > { %v2013_v39 = vpop.f32.mrf.mxu1 }
 0x37d   : > { %2086 = vst [vmem:[%s4439_s25 + $0x50] sm:$0xff] %v2070_v53  ;;  %v2073_v49 = vmin.f32 %v2057_v16, 6.0  ;;  %v2056_v7 = vmax.f32 %v2040_v50, 0.0  ;;  %v2043_v24 = vadd.f32 %v4430_v57, %v2019_v54  ;;  %v2014_v26 = vadd.f32 %v2013_v39, %v1868_v30 }
 0x37f   : > { %2089 = vst [vmem:[%s4439_s25 + $0x68] sm:$0xff] %v2073_v49  ;;  %v2072_v19 = vmin.f32 %v2056_v7, 6.0  ;;  %v2059_v23 = vmax.f32 %v2043_v24, 0.0  ;;  %v2042_v52 = vadd.f32 %v4430_v57, %v2014_v26 }
 0x381   : > { %2088 = vst [vmem:[%s4439_s25 + $0x60] sm:$0xff] %v2072_v19  ;;  %v2075_v44 = vmin.f32 %v2059_v23, 6.0  ;;  %v2058_v18 = vmax.f32 %v2042_v52, 0.0 }
 0x383   : > { %2091 = vst [vmem:[%s4439_s25 + $0x78] sm:$0xff] %v2075_v44  ;;  %v2074_v12 = vmin.f32 %v2058_v18, 6.0 }
 0x385   : > { %2090 = vst [vmem:[%s4439_s25 + $0x70] sm:$0xff] %v2074_v12 }
 0x386 PF: > { %s19_s30 = sadd.s32 1, %s2563_s30  }
 0x387   : > { %p16_p4 = scmp.ge.s32.totalorder %s19_s30, 4  }
 0x389   :  { %18 = sbr.rel (!%p16_p4) target bundleno = 1 (0x1), region = 86 }

</bundles_post_ra>
